<compile_context>
chip_gen: v5e
topology: v5e:2x2
jax: 0.10.0
libtpu: 0.0.40
codegen_flags: <defaults>
</compile_context>

<pallas_src>
import functools
import re

import jax
import jax.numpy as jnp
from jax.experimental import pallas as pl
from jax.experimental.pallas import tpu as pltpu

KSIZE = 7        # kernel_size=7 branch of the module
CONV_PAD = 3     # SAME padding for kernel_size 7


def _tpu_generation():
    try:
        kind = jax.devices()[0].device_kind.lower()
    except Exception:
        return 0
    m = re.search(r"(\d+)", kind)
    return int(m.group(1)) if m else 0


def _vmem_capacity_bytes(gen):
    try:
        cap = getattr(pltpu.get_tpu_info(), "vmem_capacity_bytes", None)
        if cap:
            return int(cap)
    except Exception:
        pass
    if gen >= 7:
        return 64 * 2**20      # v7x: 64 MiB per TensorCore
    if gen >= 4:
        return 128 * 2**20     # v4/v5e/v6e: 128 MiB
    return 64 * 2**20          # unknown: be conservative


def _spatial_attention_kernel(w_ref, x_ref, o_ref, pad_ref, *, C, H, W,
                              use_mxu_mean, native_mul):
    # w_ref  : VMEM (2, 49) f32   Conv2d(2,1,7,bias=False) weight, per-channel rows
    # x_ref  : VMEM (C, H*W)      one batch element, lane-dense
    # o_ref  : VMEM (C, H*W)
    # pad_ref: VMEM (2, PADW) f32 flat zero-haloed staging buffer for the conv
    HW = H * W
    LPAD = 3 * W + 8                     # left halo (>= 3*W + 3)
    PADW = pad_ref.shape[1]              # = HW + 6*W + 16

    x = x_ref[...]                                            # (C, HW), native dtype

    # ---- channel mean / max (lane-dense) ---------------------------------
    inv_c = jnp.float32(1.0 / C)
    if use_mxu_mean:
        # Large C on v5e/v6e: channel-sum on the otherwise-idle MXU with f32
        # accumulation (no f32 copy of the x slab).
        ones = jnp.full((8, C), 1.0, dtype=x.dtype)
        mean_hw = jnp.dot(ones, x, preferred_element_type=jnp.float32)[0:1, :] * inv_c
    else:
        # Small C (or v7x, where HBM is fast and MXU push/drain latency shows):
        # plain VPU/XLU sublane reduction.
        # TODO(synk): on v7x, fuse the mean and max reductions into one chunked
        # VPU sweep over x (single VMEM read) instead of two reductions.
        mean_hw = jnp.sum(x.astype(jnp.float32), axis=0, keepdims=True) * inv_c
    max_hw = jnp.max(x, axis=0, keepdims=True).astype(jnp.float32)    # (1, HW)

    # ---- stage the two maps into the flat zero-haloed scratch -------------
    # Re-zero only the small halos each step; the interior is fully
    # overwritten by the two wide stores below.
    pad_ref[:, 0:LPAD] = jnp.zeros((2, LPAD), jnp.float32)
    pad_ref[:, LPAD + HW:PADW] = jnp.zeros((2, PADW - LPAD - HW), jnp.float32)
    pad_ref[0:1, LPAD:LPAD + HW] = mean_hw
    pad_ref[1:2, LPAD:LPAD + HW] = max_hw

    # ---- 7x7, 2->1 channel convolution ------------------------------------
    # 49 direct (2, HW) tap loads (row + column offsets folded into one
    # unaligned slice) so only one band is live at a time; both pooled
    # channels are processed per tap via a (2,1) weight column; the column
    # wrap-around mask depends only on dj and is applied once per dj.
    col = jax.lax.broadcasted_iota(jnp.int32, (1, HW), 1) % W          # hoisted
    acc = jnp.zeros((2, HW), jnp.float32)
    for dj in range(KSIZE):
        part = jnp.zeros((2, HW), jnp.float32)
        for di in range(KSIZE):
            bs = LPAD + (di - CONV_PAD) * W - CONV_PAD + dj
            band = pad_ref[:, bs:bs + HW]                              # (2, HW)
            k = di * KSIZE + dj
            wcol = w_ref[:, k:k + 1]                                   # (2, 1)
            part = part + wcol * band
        col_ok = (col >= (CONV_PAD - dj)) & (col <= (W - 1 + CONV_PAD - dj))
        acc = acc + jnp.where(col_ok, part, 0.0)
    conv = jnp.sum(acc, axis=0, keepdims=True)                         # (1, HW)

    att = jax.nn.sigmoid(conv)                                         # (1, HW) f32

    # ---- recalibrate and store: single wide lane-dense store --------------
    if native_mul:
        # v6e/v7x with sub-32-bit activations: cast att once, multiply natively.
        o_ref[...] = (x * att.astype(x.dtype)).astype(o_ref.dtype)
    else:
        o_ref[...] = (x * att).astype(o_ref.dtype)


def spatial_attention(x, weight):
    """x: (N, C, H, W); weight: (1, 2, 7, 7) Conv2d weight, bias-free."""
    N, C, H, W = x.shape
    HW = H * W
    PADW = HW + 6 * W + 16

    gen = _tpu_generation()
    use_mxu_mean = (C >= 16) and (gen < 7)
    native_mul = (x.dtype != jnp.float32) and (gen >= 6)

    # Conv weights as a (2, 49) f32 VMEM array: row c holds the 49 taps of
    # pooled channel c (0 = mean map, 1 = max map), tap index = di*7 + dj.
    w2 = weight.reshape(2, KSIZE * KSIZE).astype(jnp.float32)
    # If H*W is not a multiple of 128 the wide stores become masked tail
    # stores; keep a lane-padded layout upstream in that case (not here).
    x_flat = x.reshape(N, C, HW)                               # lane-dense layout

    kernel = functools.partial(_spatial_attention_kernel, C=C, H=H, W=W,
                               use_mxu_mean=use_mxu_mean, native_mul=native_mul)

    # Generation-aware VMEM budget: double-buffered in/out blocks + scratch
    # + weights + headroom, clamped to ~85% of physical per-core VMEM.
    block_bytes = int(C) * int(HW) * int(x.dtype.itemsize)
    need = (4 * block_bytes                     # 2x double-buffered in + out
            + 2 * PADW * 4                      # conv staging scratch
            + 2 * 2 * KSIZE * KSIZE * 4         # double-buffered weight block
            + (2 << 20))                        # headroom for Mosaic internals
    cap = _vmem_capacity_bytes(gen)
    vmem_limit = int(min(int(0.85 * cap), max(32 * 2**20, need)))

    # TODO(synk): for very large C*H*W slabs (v7x's 64 MiB VMEM) add an H-band
    # grid axis with a 3-row conv halo instead of one whole (C, H*W) block/step.
    out_flat = pl.pallas_call(
        kernel,
        out_shape=jax.ShapeDtypeStruct((N, C, HW), x.dtype),
        grid=(N,),
        in_specs=[
            pl.BlockSpec((2, KSIZE * KSIZE), lambda n: (0, 0)),   # conv weights
            pl.BlockSpec((None, C, HW), lambda n: (n, 0, 0)),     # x slab
        ],
        out_specs=pl.BlockSpec((None, C, HW), lambda n: (n, 0, 0)),
        scratch_shapes=[pltpu.VMEM((2, PADW), jnp.float32)],
        compiler_params=pltpu.CompilerParams(
            dimension_semantics=("parallel",),
            vmem_limit_bytes=vmem_limit),
    )(w2, x_flat)
    return out_flat.reshape(N, C, H, W)


def spatial_attention_reference(x, weight):
    """Pure-JAX reference mirroring the PyTorch forward."""
    mean_map = jnp.mean(x, axis=1, keepdims=True)
    max_map = jnp.max(x, axis=1, keepdims=True)
    stacked = jnp.concatenate([mean_map, max_map], axis=1)    # (N, 2, H, W)
    conv = jax.lax.conv_general_dilated(
        stacked, weight, window_strides=(1, 1),
        padding=((CONV_PAD, CONV_PAD), (CONV_PAD, CONV_PAD)),
        dimension_numbers=("NCHW", "OIHW", "NCHW"))
    return x * jax.nn.sigmoid(conv)


if __name__ == "__main__":
    key = jax.random.PRNGKey(0)
    kx, kw = jax.random.split(key)
    N, C, H, W = 2, 4, 16, 16
    x = jax.random.normal(kx, (N, C, H, W), dtype=jnp.float32)

    # Deterministic synthetic Conv2d(2, 1, 7, bias=False) weight (kaiming-ish scale).
    fan_in = 2 * KSIZE * KSIZE
    weight = jax.random.uniform(
        kw, (1, 2, KSIZE, KSIZE), dtype=jnp.float32,
        minval=-1.0, maxval=1.0) / jnp.sqrt(fan_in)

    out = jax.block_until_ready(spatial_attention(x, weight))
    ref = jax.block_until_ready(spatial_attention_reference(x, weight))
    assert out.shape == (N, C, H, W)
    assert jnp.allclose(out, ref, atol=1e-5, rtol=1e-5)
    print("KERNEL_OK")
</pallas_src>

<mosaic_0001>
module attributes {stable_mosaic.version = 11 : i64} {
  func.func @_spatial_attention_kernel(%arg0: i32, %arg1: memref<2x49xf32, #tpu.memory_space<vmem>>, %arg2: memref<1x4x256xf32, #tpu.memory_space<vmem>>, %arg3: memref<1x4x256xf32, #tpu.memory_space<vmem>>, %arg4: memref<2x368xf32, #tpu.memory_space<vmem>>) attributes {dimension_semantics = [#tpu.dimension_semantics<parallel>], iteration_bounds = array<i64: 2>, scalar_prefetch = 0 : i64, scratch_operands = 1 : i64, tpu.core_type = #tpu.core_type<tc>, window_params = [{pipeline_mode = #tpu.pipeline_mode<synchronous>, transform_indices = @transform_0, window_bounds = array<i64: 2, 49>}, {transform_indices = @transform_1, window_bounds = array<i64: 1, 4, 256>}, {transform_indices = @transform_2, window_bounds = array<i64: 1, 4, 256>}]} {
    %c0 = arith.constant 0 : index
    %c0_0 = arith.constant 0 : index
    %c0_1 = arith.constant 0 : index
    %0 = vector.load %arg2[%c0, %c0_0, %c0_1] : memref<1x4x256xf32, #tpu.memory_space<vmem>>, vector<1x4x256xf32>
    %1 = vector.shape_cast %0 : vector<1x4x256xf32> to vector<4x256xf32>
    %cst = arith.constant dense<0.000000e+00> : vector<256xf32>
    %2 = vector.multi_reduction <add>, %1, %cst [0] : vector<4x256xf32> to vector<256xf32>
    %3 = vector.shape_cast %2 : vector<256xf32> to vector<1x256xf32>
    %cst_2 = arith.constant 2.500000e-01 : f32
    %4 = vector.broadcast %cst_2 : f32 to vector<1x256xf32>
    %5 = arith.mulf %3, %4 : vector<1x256xf32>
    %cst_3 = arith.constant dense<0xFF800000> : vector<256xf32>
    %6 = vector.multi_reduction <maximumf>, %1, %cst_3 [0] : vector<4x256xf32> to vector<256xf32>
    %7 = vector.shape_cast %6 : vector<256xf32> to vector<1x256xf32>
    %cst_4 = arith.constant 0.000000e+00 : f32
    %8 = vector.broadcast %cst_4 : f32 to vector<2x56xf32>
    %c0_5 = arith.constant 0 : index
    %c0_6 = arith.constant 0 : index
    %9 = vector.load %arg4[%c0_5, %c0_6] : memref<2x368xf32, #tpu.memory_space<vmem>>, vector<2x56xf32>
    tpu.vector_store %arg4[%c0_5, %c0_6], %8 {strides = array<i32>} : memref<2x368xf32, #tpu.memory_space<vmem>>, vector<2x56xf32>,
    %cst_7 = arith.constant 0.000000e+00 : f32
    %10 = vector.broadcast %cst_7 : f32 to vector<2x56xf32>
    %c0_8 = arith.constant 0 : index
    %c312 = arith.constant 312 : index
    %11 = vector.load %arg4[%c0_8, %c312] : memref<2x368xf32, #tpu.memory_space<vmem>>, vector<2x56xf32>
    tpu.vector_store %arg4[%c0_8, %c312], %10 {strides = array<i32>} : memref<2x368xf32, #tpu.memory_space<vmem>>, vector<2x56xf32>,
    %c0_9 = arith.constant 0 : index
    %c56 = arith.constant 56 : index
    %12 = vector.load %arg4[%c0_9, %c56] : memref<2x368xf32, #tpu.memory_space<vmem>>, vector<1x256xf32>
    tpu.vector_store %arg4[%c0_9, %c56], %5 {strides = array<i32>} : memref<2x368xf32, #tpu.memory_space<vmem>>, vector<1x256xf32>,
    %c1 = arith.constant 1 : index
    %c56_10 = arith.constant 56 : index
    %13 = vector.load %arg4[%c1, %c56_10] : memref<2x368xf32, #tpu.memory_space<vmem>>, vector<1x256xf32>
    tpu.vector_store %arg4[%c1, %c56_10], %7 {strides = array<i32>} : memref<2x368xf32, #tpu.memory_space<vmem>>, vector<1x256xf32>,
    %14 = tpu.iota {dimensions = array<i32: 1>} : vector<1x256xi32>
    %c16_i32 = arith.constant 16 : i32
    %c0_i32 = arith.constant 0 : i32
    %15 = arith.cmpi eq, %c16_i32, %c0_i32 : i32
    %c1_i32 = arith.constant 1 : i32
    %16 = arith.select %15, %c1_i32, %c16_i32 : i32
    %17 = vector.broadcast %16 : i32 to vector<1x256xi32>
    %18 = arith.remsi %14, %17 : vector<1x256xi32>
    %c0_i32_11 = arith.constant 0 : i32
    %19 = vector.broadcast %c0_i32_11 : i32 to vector<1x256xi32>
    %20 = arith.cmpi ne, %18, %19 : vector<1x256xi32>
    %c0_i32_12 = arith.constant 0 : i32
    %21 = vector.broadcast %c0_i32_12 : i32 to vector<1x256xi32>
    %22 = arith.cmpi slt, %18, %21 : vector<1x256xi32>
    %c0_i32_13 = arith.constant 0 : i32
    %23 = arith.cmpi slt, %16, %c0_i32_13 : i32
    %24 = vector.broadcast %23 : i1 to vector<1x256xi1>
    %25 = vector.broadcast %24 : vector<1x256xi1> to vector<1x256xi1>
    %26 = arith.xori %22, %25 : vector<1x256xi1>
    %27 = arith.andi %26, %20 : vector<1x256xi1>
    %28 = vector.broadcast %16 : i32 to vector<1x256xi32>
    %29 = arith.addi %18, %28 : vector<1x256xi32>
    %30 = arith.select %27, %29, %18 : vector<1x256xi1>, vector<1x256xi32>
    %cst_14 = arith.constant 0.000000e+00 : f32
    %31 = vector.broadcast %cst_14 : f32 to vector<2x256xf32>
    %cst_15 = arith.constant 0.000000e+00 : f32
    %32 = vector.broadcast %cst_15 : f32 to vector<2x256xf32>
    %c0_16 = arith.constant 0 : index
    %c5 = arith.constant 5 : index
    %33 = vector.load %arg4[%c0_16, %c5] : memref<2x368xf32, #tpu.memory_space<vmem>>, vector<2x256xf32>
    %c0_17 = arith.constant 0 : index
    %c0_18 = arith.constant 0 : index
    %34 = vector.load %arg1[%c0_17, %c0_18] : memref<2x49xf32, #tpu.memory_space<vmem>>, vector<2x1xf32>
    %35 = vector.broadcast %34 : vector<2x1xf32> to vector<2x256xf32>
    %36 = arith.mulf %35, %33 : vector<2x256xf32>
    %37 = arith.addf %32, %36 : vector<2x256xf32>
    %c0_19 = arith.constant 0 : index
    %c21 = arith.constant 21 : index
    %38 = vector.load %arg4[%c0_19, %c21] : memref<2x368xf32, #tpu.memory_space<vmem>>, vector<2x256xf32>
    %c0_20 = arith.constant 0 : index
    %c7 = arith.constant 7 : index
    %39 = vector.load %arg1[%c0_20, %c7] : memref<2x49xf32, #tpu.memory_space<vmem>>, vector<2x1xf32>
    %40 = vector.broadcast %39 : vector<2x1xf32> to vector<2x256xf32>
    %41 = arith.mulf %40, %38 : vector<2x256xf32>
    %42 = arith.addf %37, %41 : vector<2x256xf32>
    %c0_21 = arith.constant 0 : index
    %c37 = arith.constant 37 : index
    %43 = vector.load %arg4[%c0_21, %c37] : memref<2x368xf32, #tpu.memory_space<vmem>>, vector<2x256xf32>
    %c0_22 = arith.constant 0 : index
    %c14 = arith.constant 14 : index
    %44 = vector.load %arg1[%c0_22, %c14] : memref<2x49xf32, #tpu.memory_space<vmem>>, vector<2x1xf32>
    %45 = vector.broadcast %44 : vector<2x1xf32> to vector<2x256xf32>
    %46 = arith.mulf %45, %43 : vector<2x256xf32>
    %47 = arith.addf %42, %46 : vector<2x256xf32>
    %c0_23 = arith.constant 0 : index
    %c53 = arith.constant 53 : index
    %48 = vector.load %arg4[%c0_23, %c53] : memref<2x368xf32, #tpu.memory_space<vmem>>, vector<2x256xf32>
    %c0_24 = arith.constant 0 : index
    %c21_25 = arith.constant 21 : index
    %49 = vector.load %arg1[%c0_24, %c21_25] : memref<2x49xf32, #tpu.memory_space<vmem>>, vector<2x1xf32>
    %50 = vector.broadcast %49 : vector<2x1xf32> to vector<2x256xf32>
    %51 = arith.mulf %50, %48 : vector<2x256xf32>
    %52 = arith.addf %47, %51 : vector<2x256xf32>
    %c0_26 = arith.constant 0 : index
    %c69 = arith.constant 69 : index
    %53 = vector.load %arg4[%c0_26, %c69] : memref<2x368xf32, #tpu.memory_space<vmem>>, vector<2x256xf32>
    %c0_27 = arith.constant 0 : index
    %c28 = arith.constant 28 : index
    %54 = vector.load %arg1[%c0_27, %c28] : memref<2x49xf32, #tpu.memory_space<vmem>>, vector<2x1xf32>
    %55 = vector.broadcast %54 : vector<2x1xf32> to vector<2x256xf32>
    %56 = arith.mulf %55, %53 : vector<2x256xf32>
    %57 = arith.addf %52, %56 : vector<2x256xf32>
    %c0_28 = arith.constant 0 : index
    %c85 = arith.constant 85 : index
    %58 = vector.load %arg4[%c0_28, %c85] : memref<2x368xf32, #tpu.memory_space<vmem>>, vector<2x256xf32>
    %c0_29 = arith.constant 0 : index
    %c35 = arith.constant 35 : index
    %59 = vector.load %arg1[%c0_29, %c35] : memref<2x49xf32, #tpu.memory_space<vmem>>, vector<2x1xf32>
    %60 = vector.broadcast %59 : vector<2x1xf32> to vector<2x256xf32>
    %61 = arith.mulf %60, %58 : vector<2x256xf32>
    %62 = arith.addf %57, %61 : vector<2x256xf32>
    %c0_30 = arith.constant 0 : index
    %c101 = arith.constant 101 : index
    %63 = vector.load %arg4[%c0_30, %c101] : memref<2x368xf32, #tpu.memory_space<vmem>>, vector<2x256xf32>
    %c0_31 = arith.constant 0 : index
    %c42 = arith.constant 42 : index
    %64 = vector.load %arg1[%c0_31, %c42] : memref<2x49xf32, #tpu.memory_space<vmem>>, vector<2x1xf32>
    %65 = vector.broadcast %64 : vector<2x1xf32> to vector<2x256xf32>
    %66 = arith.mulf %65, %63 : vector<2x256xf32>
    %67 = arith.addf %62, %66 : vector<2x256xf32>
    %c3_i32 = arith.constant 3 : i32
    %68 = vector.broadcast %c3_i32 : i32 to vector<1x256xi32>
    %69 = arith.cmpi sge, %30, %68 : vector<1x256xi32>
    %c18_i32 = arith.constant 18 : i32
    %70 = vector.broadcast %c18_i32 : i32 to vector<1x256xi32>
    %71 = arith.cmpi sle, %30, %70 : vector<1x256xi32>
    %72 = arith.andi %69, %71 : vector<1x256xi1>
    %cst_32 = arith.constant 0.000000e+00 : f32
    %73 = vector.shape_cast %72 : vector<1x256xi1> to vector<1x256xi1>
    %74 = vector.broadcast %73 : vector<1x256xi1> to vector<2x256xi1>
    %75 = vector.broadcast %cst_32 : f32 to vector<2x256xf32>
    %76 = arith.select %74, %67, %75 : vector<2x256xi1>, vector<2x256xf32>
    %77 = arith.addf %31, %76 : vector<2x256xf32>
    %cst_33 = arith.constant 0.000000e+00 : f32
    %78 = vector.broadcast %cst_33 : f32 to vector<2x256xf32>
    %c0_34 = arith.constant 0 : index
    %c6 = arith.constant 6 : index
    %79 = vector.load %arg4[%c0_34, %c6] : memref<2x368xf32, #tpu.memory_space<vmem>>, vector<2x256xf32>
    %c0_35 = arith.constant 0 : index
    %c1_36 = arith.constant 1 : index
    %80 = vector.load %arg1[%c0_35, %c1_36] : memref<2x49xf32, #tpu.memory_space<vmem>>, vector<2x1xf32>
    %81 = vector.broadcast %80 : vector<2x1xf32> to vector<2x256xf32>
    %82 = arith.mulf %81, %79 : vector<2x256xf32>
    %83 = arith.addf %78, %82 : vector<2x256xf32>
    %c0_37 = arith.constant 0 : index
    %c22 = arith.constant 22 : index
    %84 = vector.load %arg4[%c0_37, %c22] : memref<2x368xf32, #tpu.memory_space<vmem>>, vector<2x256xf32>
    %c0_38 = arith.constant 0 : index
    %c8 = arith.constant 8 : index
    %85 = vector.load %arg1[%c0_38, %c8] : memref<2x49xf32, #tpu.memory_space<vmem>>, vector<2x1xf32>
    %86 = vector.broadcast %85 : vector<2x1xf32> to vector<2x256xf32>
    %87 = arith.mulf %86, %84 : vector<2x256xf32>
    %88 = arith.addf %83, %87 : vector<2x256xf32>
    %c0_39 = arith.constant 0 : index
    %c38 = arith.constant 38 : index
    %89 = vector.load %arg4[%c0_39, %c38] : memref<2x368xf32, #tpu.memory_space<vmem>>, vector<2x256xf32>
    %c0_40 = arith.constant 0 : index
    %c15 = arith.constant 15 : index
    %90 = vector.load %arg1[%c0_40, %c15] : memref<2x49xf32, #tpu.memory_space<vmem>>, vector<2x1xf32>
    %91 = vector.broadcast %90 : vector<2x1xf32> to vector<2x256xf32>
    %92 = arith.mulf %91, %89 : vector<2x256xf32>
    %93 = arith.addf %88, %92 : vector<2x256xf32>
    %c0_41 = arith.constant 0 : index
    %c54 = arith.constant 54 : index
    %94 = vector.load %arg4[%c0_41, %c54] : memref<2x368xf32, #tpu.memory_space<vmem>>, vector<2x256xf32>
    %c0_42 = arith.constant 0 : index
    %c22_43 = arith.constant 22 : index
    %95 = vector.load %arg1[%c0_42, %c22_43] : memref<2x49xf32, #tpu.memory_space<vmem>>, vector<2x1xf32>
    %96 = vector.broadcast %95 : vector<2x1xf32> to vector<2x256xf32>
    %97 = arith.mulf %96, %94 : vector<2x256xf32>
    %98 = arith.addf %93, %97 : vector<2x256xf32>
    %c0_44 = arith.constant 0 : index
    %c70 = arith.constant 70 : index
    %99 = vector.load %arg4[%c0_44, %c70] : memref<2x368xf32, #tpu.memory_space<vmem>>, vector<2x256xf32>
    %c0_45 = arith.constant 0 : index
    %c29 = arith.constant 29 : index
    %100 = vector.load %arg1[%c0_45, %c29] : memref<2x49xf32, #tpu.memory_space<vmem>>, vector<2x1xf32>
    %101 = vector.broadcast %100 : vector<2x1xf32> to vector<2x256xf32>
    %102 = arith.mulf %101, %99 : vector<2x256xf32>
    %103 = arith.addf %98, %102 : vector<2x256xf32>
    %c0_46 = arith.constant 0 : index
    %c86 = arith.constant 86 : index
    %104 = vector.load %arg4[%c0_46, %c86] : memref<2x368xf32, #tpu.memory_space<vmem>>, vector<2x256xf32>
    %c0_47 = arith.constant 0 : index
    %c36 = arith.constant 36 : index
    %105 = vector.load %arg1[%c0_47, %c36] : memref<2x49xf32, #tpu.memory_space<vmem>>, vector<2x1xf32>
    %106 = vector.broadcast %105 : vector<2x1xf32> to vector<2x256xf32>
    %107 = arith.mulf %106, %104 : vector<2x256xf32>
    %108 = arith.addf %103, %107 : vector<2x256xf32>
    %c0_48 = arith.constant 0 : index
    %c102 = arith.constant 102 : index
    %109 = vector.load %arg4[%c0_48, %c102] : memref<2x368xf32, #tpu.memory_space<vmem>>, vector<2x256xf32>
    %c0_49 = arith.constant 0 : index
    %c43 = arith.constant 43 : index
    %110 = vector.load %arg1[%c0_49, %c43] : memref<2x49xf32, #tpu.memory_space<vmem>>, vector<2x1xf32>
    %111 = vector.broadcast %110 : vector<2x1xf32> to vector<2x256xf32>
    %112 = arith.mulf %111, %109 : vector<2x256xf32>
    %113 = arith.addf %108, %112 : vector<2x256xf32>
    %c2_i32 = arith.constant 2 : i32
    %114 = vector.broadcast %c2_i32 : i32 to vector<1x256xi32>
    %115 = arith.cmpi sge, %30, %114 : vector<1x256xi32>
    %c17_i32 = arith.constant 17 : i32
    %116 = vector.broadcast %c17_i32 : i32 to vector<1x256xi32>
    %117 = arith.cmpi sle, %30, %116 : vector<1x256xi32>
    %118 = arith.andi %115, %117 : vector<1x256xi1>
    %cst_50 = arith.constant 0.000000e+00 : f32
    %119 = vector.shape_cast %118 : vector<1x256xi1> to vector<1x256xi1>
    %120 = vector.broadcast %119 : vector<1x256xi1> to vector<2x256xi1>
    %121 = vector.broadcast %cst_50 : f32 to vector<2x256xf32>
    %122 = arith.select %120, %113, %121 : vector<2x256xi1>, vector<2x256xf32>
    %123 = arith.addf %77, %122 : vector<2x256xf32>
    %cst_51 = arith.constant 0.000000e+00 : f32
    %124 = vector.broadcast %cst_51 : f32 to vector<2x256xf32>
    %c0_52 = arith.constant 0 : index
    %c7_53 = arith.constant 7 : index
    %125 = vector.load %arg4[%c0_52, %c7_53] : memref<2x368xf32, #tpu.memory_space<vmem>>, vector<2x256xf32>
    %c0_54 = arith.constant 0 : index
    %c2 = arith.constant 2 : index
    %126 = vector.load %arg1[%c0_54, %c2] : memref<2x49xf32, #tpu.memory_space<vmem>>, vector<2x1xf32>
    %127 = vector.broadcast %126 : vector<2x1xf32> to vector<2x256xf32>
    %128 = arith.mulf %127, %125 : vector<2x256xf32>
    %129 = arith.addf %124, %128 : vector<2x256xf32>
    %c0_55 = arith.constant 0 : index
    %c23 = arith.constant 23 : index
    %130 = vector.load %arg4[%c0_55, %c23] : memref<2x368xf32, #tpu.memory_space<vmem>>, vector<2x256xf32>
    %c0_56 = arith.constant 0 : index
    %c9 = arith.constant 9 : index
    %131 = vector.load %arg1[%c0_56, %c9] : memref<2x49xf32, #tpu.memory_space<vmem>>, vector<2x1xf32>
    %132 = vector.broadcast %131 : vector<2x1xf32> to vector<2x256xf32>
    %133 = arith.mulf %132, %130 : vector<2x256xf32>
    %134 = arith.addf %129, %133 : vector<2x256xf32>
    %c0_57 = arith.constant 0 : index
    %c39 = arith.constant 39 : index
    %135 = vector.load %arg4[%c0_57, %c39] : memref<2x368xf32, #tpu.memory_space<vmem>>, vector<2x256xf32>
    %c0_58 = arith.constant 0 : index
    %c16 = arith.constant 16 : index
    %136 = vector.load %arg1[%c0_58, %c16] : memref<2x49xf32, #tpu.memory_space<vmem>>, vector<2x1xf32>
    %137 = vector.broadcast %136 : vector<2x1xf32> to vector<2x256xf32>
    %138 = arith.mulf %137, %135 : vector<2x256xf32>
    %139 = arith.addf %134, %138 : vector<2x256xf32>
    %c0_59 = arith.constant 0 : index
    %c55 = arith.constant 55 : index
    %140 = vector.load %arg4[%c0_59, %c55] : memref<2x368xf32, #tpu.memory_space<vmem>>, vector<2x256xf32>
    %c0_60 = arith.constant 0 : index
    %c23_61 = arith.constant 23 : index
    %141 = vector.load %arg1[%c0_60, %c23_61] : memref<2x49xf32, #tpu.memory_space<vmem>>, vector<2x1xf32>
    %142 = vector.broadcast %141 : vector<2x1xf32> to vector<2x256xf32>
    %143 = arith.mulf %142, %140 : vector<2x256xf32>
    %144 = arith.addf %139, %143 : vector<2x256xf32>
    %c0_62 = arith.constant 0 : index
    %c71 = arith.constant 71 : index
    %145 = vector.load %arg4[%c0_62, %c71] : memref<2x368xf32, #tpu.memory_space<vmem>>, vector<2x256xf32>
    %c0_63 = arith.constant 0 : index
    %c30 = arith.constant 30 : index
    %146 = vector.load %arg1[%c0_63, %c30] : memref<2x49xf32, #tpu.memory_space<vmem>>, vector<2x1xf32>
    %147 = vector.broadcast %146 : vector<2x1xf32> to vector<2x256xf32>
    %148 = arith.mulf %147, %145 : vector<2x256xf32>
    %149 = arith.addf %144, %148 : vector<2x256xf32>
    %c0_64 = arith.constant 0 : index
    %c87 = arith.constant 87 : index
    %150 = vector.load %arg4[%c0_64, %c87] : memref<2x368xf32, #tpu.memory_space<vmem>>, vector<2x256xf32>
    %c0_65 = arith.constant 0 : index
    %c37_66 = arith.constant 37 : index
    %151 = vector.load %arg1[%c0_65, %c37_66] : memref<2x49xf32, #tpu.memory_space<vmem>>, vector<2x1xf32>
    %152 = vector.broadcast %151 : vector<2x1xf32> to vector<2x256xf32>
    %153 = arith.mulf %152, %150 : vector<2x256xf32>
    %154 = arith.addf %149, %153 : vector<2x256xf32>
    %c0_67 = arith.constant 0 : index
    %c103 = arith.constant 103 : index
    %155 = vector.load %arg4[%c0_67, %c103] : memref<2x368xf32, #tpu.memory_space<vmem>>, vector<2x256xf32>
    %c0_68 = arith.constant 0 : index
    %c44 = arith.constant 44 : index
    %156 = vector.load %arg1[%c0_68, %c44] : memref<2x49xf32, #tpu.memory_space<vmem>>, vector<2x1xf32>
    %157 = vector.broadcast %156 : vector<2x1xf32> to vector<2x256xf32>
    %158 = arith.mulf %157, %155 : vector<2x256xf32>
    %159 = arith.addf %154, %158 : vector<2x256xf32>
    %c1_i32_69 = arith.constant 1 : i32
    %160 = vector.broadcast %c1_i32_69 : i32 to vector<1x256xi32>
    %161 = arith.cmpi sge, %30, %160 : vector<1x256xi32>
    %c16_i32_70 = arith.constant 16 : i32
    %162 = vector.broadcast %c16_i32_70 : i32 to vector<1x256xi32>
    %163 = arith.cmpi sle, %30, %162 : vector<1x256xi32>
    %164 = arith.andi %161, %163 : vector<1x256xi1>
    %cst_71 = arith.constant 0.000000e+00 : f32
    %165 = vector.shape_cast %164 : vector<1x256xi1> to vector<1x256xi1>
    %166 = vector.broadcast %165 : vector<1x256xi1> to vector<2x256xi1>
    %167 = vector.broadcast %cst_71 : f32 to vector<2x256xf32>
    %168 = arith.select %166, %159, %167 : vector<2x256xi1>, vector<2x256xf32>
    %169 = arith.addf %123, %168 : vector<2x256xf32>
    %cst_72 = arith.constant 0.000000e+00 : f32
    %170 = vector.broadcast %cst_72 : f32 to vector<2x256xf32>
    %c0_73 = arith.constant 0 : index
    %c8_74 = arith.constant 8 : index
    %171 = vector.load %arg4[%c0_73, %c8_74] : memref<2x368xf32, #tpu.memory_space<vmem>>, vector<2x256xf32>
    %c0_75 = arith.constant 0 : index
    %c3 = arith.constant 3 : index
    %172 = vector.load %arg1[%c0_75, %c3] : memref<2x49xf32, #tpu.memory_space<vmem>>, vector<2x1xf32>
    %173 = vector.broadcast %172 : vector<2x1xf32> to vector<2x256xf32>
    %174 = arith.mulf %173, %171 : vector<2x256xf32>
    %175 = arith.addf %170, %174 : vector<2x256xf32>
    %c0_76 = arith.constant 0 : index
    %c24 = arith.constant 24 : index
    %176 = vector.load %arg4[%c0_76, %c24] : memref<2x368xf32, #tpu.memory_space<vmem>>, vector<2x256xf32>
    %c0_77 = arith.constant 0 : index
    %c10 = arith.constant 10 : index
    %177 = vector.load %arg1[%c0_77, %c10] : memref<2x49xf32, #tpu.memory_space<vmem>>, vector<2x1xf32>
    %178 = vector.broadcast %177 : vector<2x1xf32> to vector<2x256xf32>
    %179 = arith.mulf %178, %176 : vector<2x256xf32>
    %180 = arith.addf %175, %179 : vector<2x256xf32>
    %c0_78 = arith.constant 0 : index
    %c40 = arith.constant 40 : index
    %181 = vector.load %arg4[%c0_78, %c40] : memref<2x368xf32, #tpu.memory_space<vmem>>, vector<2x256xf32>
    %c0_79 = arith.constant 0 : index
    %c17 = arith.constant 17 : index
    %182 = vector.load %arg1[%c0_79, %c17] : memref<2x49xf32, #tpu.memory_space<vmem>>, vector<2x1xf32>
    %183 = vector.broadcast %182 : vector<2x1xf32> to vector<2x256xf32>
    %184 = arith.mulf %183, %181 : vector<2x256xf32>
    %185 = arith.addf %180, %184 : vector<2x256xf32>
    %c0_80 = arith.constant 0 : index
    %c56_81 = arith.constant 56 : index
    %186 = vector.load %arg4[%c0_80, %c56_81] : memref<2x368xf32, #tpu.memory_space<vmem>>, vector<2x256xf32>
    %c0_82 = arith.constant 0 : index
    %c24_83 = arith.constant 24 : index
    %187 = vector.load %arg1[%c0_82, %c24_83] : memref<2x49xf32, #tpu.memory_space<vmem>>, vector<2x1xf32>
    %188 = vector.broadcast %187 : vector<2x1xf32> to vector<2x256xf32>
    %189 = arith.mulf %188, %186 : vector<2x256xf32>
    %190 = arith.addf %185, %189 : vector<2x256xf32>
    %c0_84 = arith.constant 0 : index
    %c72 = arith.constant 72 : index
    %191 = vector.load %arg4[%c0_84, %c72] : memref<2x368xf32, #tpu.memory_space<vmem>>, vector<2x256xf32>
    %c0_85 = arith.constant 0 : index
    %c31 = arith.constant 31 : index
    %192 = vector.load %arg1[%c0_85, %c31] : memref<2x49xf32, #tpu.memory_space<vmem>>, vector<2x1xf32>
    %193 = vector.broadcast %192 : vector<2x1xf32> to vector<2x256xf32>
    %194 = arith.mulf %193, %191 : vector<2x256xf32>
    %195 = arith.addf %190, %194 : vector<2x256xf32>
    %c0_86 = arith.constant 0 : index
    %c88 = arith.constant 88 : index
    %196 = vector.load %arg4[%c0_86, %c88] : memref<2x368xf32, #tpu.memory_space<vmem>>, vector<2x256xf32>
    %c0_87 = arith.constant 0 : index
    %c38_88 = arith.constant 38 : index
    %197 = vector.load %arg1[%c0_87, %c38_88] : memref<2x49xf32, #tpu.memory_space<vmem>>, vector<2x1xf32>
    %198 = vector.broadcast %197 : vector<2x1xf32> to vector<2x256xf32>
    %199 = arith.mulf %198, %196 : vector<2x256xf32>
    %200 = arith.addf %195, %199 : vector<2x256xf32>
    %c0_89 = arith.constant 0 : index
    %c104 = arith.constant 104 : index
    %201 = vector.load %arg4[%c0_89, %c104] : memref<2x368xf32, #tpu.memory_space<vmem>>, vector<2x256xf32>
    %c0_90 = arith.constant 0 : index
    %c45 = arith.constant 45 : index
    %202 = vector.load %arg1[%c0_90, %c45] : memref<2x49xf32, #tpu.memory_space<vmem>>, vector<2x1xf32>
    %203 = vector.broadcast %202 : vector<2x1xf32> to vector<2x256xf32>
    %204 = arith.mulf %203, %201 : vector<2x256xf32>
    %205 = arith.addf %200, %204 : vector<2x256xf32>
    %c0_i32_91 = arith.constant 0 : i32
    %206 = vector.broadcast %c0_i32_91 : i32 to vector<1x256xi32>
    %207 = arith.cmpi sge, %30, %206 : vector<1x256xi32>
    %c15_i32 = arith.constant 15 : i32
    %208 = vector.broadcast %c15_i32 : i32 to vector<1x256xi32>
    %209 = arith.cmpi sle, %30, %208 : vector<1x256xi32>
    %210 = arith.andi %207, %209 : vector<1x256xi1>
    %cst_92 = arith.constant 0.000000e+00 : f32
    %211 = vector.shape_cast %210 : vector<1x256xi1> to vector<1x256xi1>
    %212 = vector.broadcast %211 : vector<1x256xi1> to vector<2x256xi1>
    %213 = vector.broadcast %cst_92 : f32 to vector<2x256xf32>
    %214 = arith.select %212, %205, %213 : vector<2x256xi1>, vector<2x256xf32>
    %215 = arith.addf %169, %214 : vector<2x256xf32>
    %cst_93 = arith.constant 0.000000e+00 : f32
    %216 = vector.broadcast %cst_93 : f32 to vector<2x256xf32>
    %c0_94 = arith.constant 0 : index
    %c9_95 = arith.constant 9 : index
    %217 = vector.load %arg4[%c0_94, %c9_95] : memref<2x368xf32, #tpu.memory_space<vmem>>, vector<2x256xf32>
    %c0_96 = arith.constant 0 : index
    %c4 = arith.constant 4 : index
    %218 = vector.load %arg1[%c0_96, %c4] : memref<2x49xf32, #tpu.memory_space<vmem>>, vector<2x1xf32>
    %219 = vector.broadcast %218 : vector<2x1xf32> to vector<2x256xf32>
    %220 = arith.mulf %219, %217 : vector<2x256xf32>
    %221 = arith.addf %216, %220 : vector<2x256xf32>
    %c0_97 = arith.constant 0 : index
    %c25 = arith.constant 25 : index
    %222 = vector.load %arg4[%c0_97, %c25] : memref<2x368xf32, #tpu.memory_space<vmem>>, vector<2x256xf32>
    %c0_98 = arith.constant 0 : index
    %c11 = arith.constant 11 : index
    %223 = vector.load %arg1[%c0_98, %c11] : memref<2x49xf32, #tpu.memory_space<vmem>>, vector<2x1xf32>
    %224 = vector.broadcast %223 : vector<2x1xf32> to vector<2x256xf32>
    %225 = arith.mulf %224, %222 : vector<2x256xf32>
    %226 = arith.addf %221, %225 : vector<2x256xf32>
    %c0_99 = arith.constant 0 : index
    %c41 = arith.constant 41 : index
    %227 = vector.load %arg4[%c0_99, %c41] : memref<2x368xf32, #tpu.memory_space<vmem>>, vector<2x256xf32>
    %c0_100 = arith.constant 0 : index
    %c18 = arith.constant 18 : index
    %228 = vector.load %arg1[%c0_100, %c18] : memref<2x49xf32, #tpu.memory_space<vmem>>, vector<2x1xf32>
    %229 = vector.broadcast %228 : vector<2x1xf32> to vector<2x256xf32>
    %230 = arith.mulf %229, %227 : vector<2x256xf32>
    %231 = arith.addf %226, %230 : vector<2x256xf32>
    %c0_101 = arith.constant 0 : index
    %c57 = arith.constant 57 : index
    %232 = vector.load %arg4[%c0_101, %c57] : memref<2x368xf32, #tpu.memory_space<vmem>>, vector<2x256xf32>
    %c0_102 = arith.constant 0 : index
    %c25_103 = arith.constant 25 : index
    %233 = vector.load %arg1[%c0_102, %c25_103] : memref<2x49xf32, #tpu.memory_space<vmem>>, vector<2x1xf32>
    %234 = vector.broadcast %233 : vector<2x1xf32> to vector<2x256xf32>
    %235 = arith.mulf %234, %232 : vector<2x256xf32>
    %236 = arith.addf %231, %235 : vector<2x256xf32>
    %c0_104 = arith.constant 0 : index
    %c73 = arith.constant 73 : index
    %237 = vector.load %arg4[%c0_104, %c73] : memref<2x368xf32, #tpu.memory_space<vmem>>, vector<2x256xf32>
    %c0_105 = arith.constant 0 : index
    %c32 = arith.constant 32 : index
    %238 = vector.load %arg1[%c0_105, %c32] : memref<2x49xf32, #tpu.memory_space<vmem>>, vector<2x1xf32>
    %239 = vector.broadcast %238 : vector<2x1xf32> to vector<2x256xf32>
    %240 = arith.mulf %239, %237 : vector<2x256xf32>
    %241 = arith.addf %236, %240 : vector<2x256xf32>
    %c0_106 = arith.constant 0 : index
    %c89 = arith.constant 89 : index
    %242 = vector.load %arg4[%c0_106, %c89] : memref<2x368xf32, #tpu.memory_space<vmem>>, vector<2x256xf32>
    %c0_107 = arith.constant 0 : index
    %c39_108 = arith.constant 39 : index
    %243 = vector.load %arg1[%c0_107, %c39_108] : memref<2x49xf32, #tpu.memory_space<vmem>>, vector<2x1xf32>
    %244 = vector.broadcast %243 : vector<2x1xf32> to vector<2x256xf32>
    %245 = arith.mulf %244, %242 : vector<2x256xf32>
    %246 = arith.addf %241, %245 : vector<2x256xf32>
    %c0_109 = arith.constant 0 : index
    %c105 = arith.constant 105 : index
    %247 = vector.load %arg4[%c0_109, %c105] : memref<2x368xf32, #tpu.memory_space<vmem>>, vector<2x256xf32>
    %c0_110 = arith.constant 0 : index
    %c46 = arith.constant 46 : index
    %248 = vector.load %arg1[%c0_110, %c46] : memref<2x49xf32, #tpu.memory_space<vmem>>, vector<2x1xf32>
    %249 = vector.broadcast %248 : vector<2x1xf32> to vector<2x256xf32>
    %250 = arith.mulf %249, %247 : vector<2x256xf32>
    %251 = arith.addf %246, %250 : vector<2x256xf32>
    %c-1_i32 = arith.constant -1 : i32
    %252 = vector.broadcast %c-1_i32 : i32 to vector<1x256xi32>
    %253 = arith.cmpi sge, %30, %252 : vector<1x256xi32>
    %c14_i32 = arith.constant 14 : i32
    %254 = vector.broadcast %c14_i32 : i32 to vector<1x256xi32>
    %255 = arith.cmpi sle, %30, %254 : vector<1x256xi32>
    %256 = arith.andi %253, %255 : vector<1x256xi1>
    %cst_111 = arith.constant 0.000000e+00 : f32
    %257 = vector.shape_cast %256 : vector<1x256xi1> to vector<1x256xi1>
    %258 = vector.broadcast %257 : vector<1x256xi1> to vector<2x256xi1>
    %259 = vector.broadcast %cst_111 : f32 to vector<2x256xf32>
    %260 = arith.select %258, %251, %259 : vector<2x256xi1>, vector<2x256xf32>
    %261 = arith.addf %215, %260 : vector<2x256xf32>
    %cst_112 = arith.constant 0.000000e+00 : f32
    %262 = vector.broadcast %cst_112 : f32 to vector<2x256xf32>
    %c0_113 = arith.constant 0 : index
    %c10_114 = arith.constant 10 : index
    %263 = vector.load %arg4[%c0_113, %c10_114] : memref<2x368xf32, #tpu.memory_space<vmem>>, vector<2x256xf32>
    %c0_115 = arith.constant 0 : index
    %c5_116 = arith.constant 5 : index
    %264 = vector.load %arg1[%c0_115, %c5_116] : memref<2x49xf32, #tpu.memory_space<vmem>>, vector<2x1xf32>
    %265 = vector.broadcast %264 : vector<2x1xf32> to vector<2x256xf32>
    %266 = arith.mulf %265, %263 : vector<2x256xf32>
    %267 = arith.addf %262, %266 : vector<2x256xf32>
    %c0_117 = arith.constant 0 : index
    %c26 = arith.constant 26 : index
    %268 = vector.load %arg4[%c0_117, %c26] : memref<2x368xf32, #tpu.memory_space<vmem>>, vector<2x256xf32>
    %c0_118 = arith.constant 0 : index
    %c12 = arith.constant 12 : index
    %269 = vector.load %arg1[%c0_118, %c12] : memref<2x49xf32, #tpu.memory_space<vmem>>, vector<2x1xf32>
    %270 = vector.broadcast %269 : vector<2x1xf32> to vector<2x256xf32>
    %271 = arith.mulf %270, %268 : vector<2x256xf32>
    %272 = arith.addf %267, %271 : vector<2x256xf32>
    %c0_119 = arith.constant 0 : index
    %c42_120 = arith.constant 42 : index
    %273 = vector.load %arg4[%c0_119, %c42_120] : memref<2x368xf32, #tpu.memory_space<vmem>>, vector<2x256xf32>
    %c0_121 = arith.constant 0 : index
    %c19 = arith.constant 19 : index
    %274 = vector.load %arg1[%c0_121, %c19] : memref<2x49xf32, #tpu.memory_space<vmem>>, vector<2x1xf32>
    %275 = vector.broadcast %274 : vector<2x1xf32> to vector<2x256xf32>
    %276 = arith.mulf %275, %273 : vector<2x256xf32>
    %277 = arith.addf %272, %276 : vector<2x256xf32>
    %c0_122 = arith.constant 0 : index
    %c58 = arith.constant 58 : index
    %278 = vector.load %arg4[%c0_122, %c58] : memref<2x368xf32, #tpu.memory_space<vmem>>, vector<2x256xf32>
    %c0_123 = arith.constant 0 : index
    %c26_124 = arith.constant 26 : index
    %279 = vector.load %arg1[%c0_123, %c26_124] : memref<2x49xf32, #tpu.memory_space<vmem>>, vector<2x1xf32>
    %280 = vector.broadcast %279 : vector<2x1xf32> to vector<2x256xf32>
    %281 = arith.mulf %280, %278 : vector<2x256xf32>
    %282 = arith.addf %277, %281 : vector<2x256xf32>
    %c0_125 = arith.constant 0 : index
    %c74 = arith.constant 74 : index
    %283 = vector.load %arg4[%c0_125, %c74] : memref<2x368xf32, #tpu.memory_space<vmem>>, vector<2x256xf32>
    %c0_126 = arith.constant 0 : index
    %c33 = arith.constant 33 : index
    %284 = vector.load %arg1[%c0_126, %c33] : memref<2x49xf32, #tpu.memory_space<vmem>>, vector<2x1xf32>
    %285 = vector.broadcast %284 : vector<2x1xf32> to vector<2x256xf32>
    %286 = arith.mulf %285, %283 : vector<2x256xf32>
    %287 = arith.addf %282, %286 : vector<2x256xf32>
    %c0_127 = arith.constant 0 : index
    %c90 = arith.constant 90 : index
    %288 = vector.load %arg4[%c0_127, %c90] : memref<2x368xf32, #tpu.memory_space<vmem>>, vector<2x256xf32>
    %c0_128 = arith.constant 0 : index
    %c40_129 = arith.constant 40 : index
    %289 = vector.load %arg1[%c0_128, %c40_129] : memref<2x49xf32, #tpu.memory_space<vmem>>, vector<2x1xf32>
    %290 = vector.broadcast %289 : vector<2x1xf32> to vector<2x256xf32>
    %291 = arith.mulf %290, %288 : vector<2x256xf32>
    %292 = arith.addf %287, %291 : vector<2x256xf32>
    %c0_130 = arith.constant 0 : index
    %c106 = arith.constant 106 : index
    %293 = vector.load %arg4[%c0_130, %c106] : memref<2x368xf32, #tpu.memory_space<vmem>>, vector<2x256xf32>
    %c0_131 = arith.constant 0 : index
    %c47 = arith.constant 47 : index
    %294 = vector.load %arg1[%c0_131, %c47] : memref<2x49xf32, #tpu.memory_space<vmem>>, vector<2x1xf32>
    %295 = vector.broadcast %294 : vector<2x1xf32> to vector<2x256xf32>
    %296 = arith.mulf %295, %293 : vector<2x256xf32>
    %297 = arith.addf %292, %296 : vector<2x256xf32>
    %c-2_i32 = arith.constant -2 : i32
    %298 = vector.broadcast %c-2_i32 : i32 to vector<1x256xi32>
    %299 = arith.cmpi sge, %30, %298 : vector<1x256xi32>
    %c13_i32 = arith.constant 13 : i32
    %300 = vector.broadcast %c13_i32 : i32 to vector<1x256xi32>
    %301 = arith.cmpi sle, %30, %300 : vector<1x256xi32>
    %302 = arith.andi %299, %301 : vector<1x256xi1>
    %cst_132 = arith.constant 0.000000e+00 : f32
    %303 = vector.shape_cast %302 : vector<1x256xi1> to vector<1x256xi1>
    %304 = vector.broadcast %303 : vector<1x256xi1> to vector<2x256xi1>
    %305 = vector.broadcast %cst_132 : f32 to vector<2x256xf32>
    %306 = arith.select %304, %297, %305 : vector<2x256xi1>, vector<2x256xf32>
    %307 = arith.addf %261, %306 : vector<2x256xf32>
    %cst_133 = arith.constant 0.000000e+00 : f32
    %308 = vector.broadcast %cst_133 : f32 to vector<2x256xf32>
    %c0_134 = arith.constant 0 : index
    %c11_135 = arith.constant 11 : index
    %309 = vector.load %arg4[%c0_134, %c11_135] : memref<2x368xf32, #tpu.memory_space<vmem>>, vector<2x256xf32>
    %c0_136 = arith.constant 0 : index
    %c6_137 = arith.constant 6 : index
    %310 = vector.load %arg1[%c0_136, %c6_137] : memref<2x49xf32, #tpu.memory_space<vmem>>, vector<2x1xf32>
    %311 = vector.broadcast %310 : vector<2x1xf32> to vector<2x256xf32>
    %312 = arith.mulf %311, %309 : vector<2x256xf32>
    %313 = arith.addf %308, %312 : vector<2x256xf32>
    %c0_138 = arith.constant 0 : index
    %c27 = arith.constant 27 : index
    %314 = vector.load %arg4[%c0_138, %c27] : memref<2x368xf32, #tpu.memory_space<vmem>>, vector<2x256xf32>
    %c0_139 = arith.constant 0 : index
    %c13 = arith.constant 13 : index
    %315 = vector.load %arg1[%c0_139, %c13] : memref<2x49xf32, #tpu.memory_space<vmem>>, vector<2x1xf32>
    %316 = vector.broadcast %315 : vector<2x1xf32> to vector<2x256xf32>
    %317 = arith.mulf %316, %314 : vector<2x256xf32>
    %318 = arith.addf %313, %317 : vector<2x256xf32>
    %c0_140 = arith.constant 0 : index
    %c43_141 = arith.constant 43 : index
    %319 = vector.load %arg4[%c0_140, %c43_141] : memref<2x368xf32, #tpu.memory_space<vmem>>, vector<2x256xf32>
    %c0_142 = arith.constant 0 : index
    %c20 = arith.constant 20 : index
    %320 = vector.load %arg1[%c0_142, %c20] : memref<2x49xf32, #tpu.memory_space<vmem>>, vector<2x1xf32>
    %321 = vector.broadcast %320 : vector<2x1xf32> to vector<2x256xf32>
    %322 = arith.mulf %321, %319 : vector<2x256xf32>
    %323 = arith.addf %318, %322 : vector<2x256xf32>
    %c0_143 = arith.constant 0 : index
    %c59 = arith.constant 59 : index
    %324 = vector.load %arg4[%c0_143, %c59] : memref<2x368xf32, #tpu.memory_space<vmem>>, vector<2x256xf32>
    %c0_144 = arith.constant 0 : index
    %c27_145 = arith.constant 27 : index
    %325 = vector.load %arg1[%c0_144, %c27_145] : memref<2x49xf32, #tpu.memory_space<vmem>>, vector<2x1xf32>
    %326 = vector.broadcast %325 : vector<2x1xf32> to vector<2x256xf32>
    %327 = arith.mulf %326, %324 : vector<2x256xf32>
    %328 = arith.addf %323, %327 : vector<2x256xf32>
    %c0_146 = arith.constant 0 : index
    %c75 = arith.constant 75 : index
    %329 = vector.load %arg4[%c0_146, %c75] : memref<2x368xf32, #tpu.memory_space<vmem>>, vector<2x256xf32>
    %c0_147 = arith.constant 0 : index
    %c34 = arith.constant 34 : index
    %330 = vector.load %arg1[%c0_147, %c34] : memref<2x49xf32, #tpu.memory_space<vmem>>, vector<2x1xf32>
    %331 = vector.broadcast %330 : vector<2x1xf32> to vector<2x256xf32>
    %332 = arith.mulf %331, %329 : vector<2x256xf32>
    %333 = arith.addf %328, %332 : vector<2x256xf32>
    %c0_148 = arith.constant 0 : index
    %c91 = arith.constant 91 : index
    %334 = vector.load %arg4[%c0_148, %c91] : memref<2x368xf32, #tpu.memory_space<vmem>>, vector<2x256xf32>
    %c0_149 = arith.constant 0 : index
    %c41_150 = arith.constant 41 : index
    %335 = vector.load %arg1[%c0_149, %c41_150] : memref<2x49xf32, #tpu.memory_space<vmem>>, vector<2x1xf32>
    %336 = vector.broadcast %335 : vector<2x1xf32> to vector<2x256xf32>
    %337 = arith.mulf %336, %334 : vector<2x256xf32>
    %338 = arith.addf %333, %337 : vector<2x256xf32>
    %c0_151 = arith.constant 0 : index
    %c107 = arith.constant 107 : index
    %339 = vector.load %arg4[%c0_151, %c107] : memref<2x368xf32, #tpu.memory_space<vmem>>, vector<2x256xf32>
    %c0_152 = arith.constant 0 : index
    %c48 = arith.constant 48 : index
    %340 = vector.load %arg1[%c0_152, %c48] : memref<2x49xf32, #tpu.memory_space<vmem>>, vector<2x1xf32>
    %341 = vector.broadcast %340 : vector<2x1xf32> to vector<2x256xf32>
    %342 = arith.mulf %341, %339 : vector<2x256xf32>
    %343 = arith.addf %338, %342 : vector<2x256xf32>
    %c-3_i32 = arith.constant -3 : i32
    %344 = vector.broadcast %c-3_i32 : i32 to vector<1x256xi32>
    %345 = arith.cmpi sge, %30, %344 : vector<1x256xi32>
    %c12_i32 = arith.constant 12 : i32
    %346 = vector.broadcast %c12_i32 : i32 to vector<1x256xi32>
    %347 = arith.cmpi sle, %30, %346 : vector<1x256xi32>
    %348 = arith.andi %345, %347 : vector<1x256xi1>
    %cst_153 = arith.constant 0.000000e+00 : f32
    %349 = vector.shape_cast %348 : vector<1x256xi1> to vector<1x256xi1>
    %350 = vector.broadcast %349 : vector<1x256xi1> to vector<2x256xi1>
    %351 = vector.broadcast %cst_153 : f32 to vector<2x256xf32>
    %352 = arith.select %350, %343, %351 : vector<2x256xi1>, vector<2x256xf32>
    %353 = arith.addf %307, %352 : vector<2x256xf32>
    %cst_154 = arith.constant dense<0.000000e+00> : vector<256xf32>
    %354 = vector.multi_reduction <add>, %353, %cst_154 [0] : vector<2x256xf32> to vector<256xf32>
    %355 = vector.shape_cast %354 : vector<256xf32> to vector<1x256xf32>
    %356 = arith.negf %355 : vector<1x256xf32>
    %357 = math.exp %356 : vector<1x256xf32>
    %cst_155 = arith.constant 1.000000e+00 : f32
    %358 = vector.broadcast %cst_155 : f32 to vector<1x256xf32>
    %359 = arith.addf %358, %357 : vector<1x256xf32>
    %360 = arith.divf %358, %359 : vector<1x256xf32>
    %361 = vector.broadcast %360 : vector<1x256xf32> to vector<4x256xf32>
    %362 = arith.mulf %1, %361 : vector<4x256xf32>
    %c0_156 = arith.constant 0 : index
    %c0_157 = arith.constant 0 : index
    %c0_158 = arith.constant 0 : index
    %363 = vector.load %arg3[%c0_156, %c0_157, %c0_158] : memref<1x4x256xf32, #tpu.memory_space<vmem>>, vector<1x4x256xf32>
    %364 = vector.shape_cast %363 : vector<1x4x256xf32> to vector<4x256xf32>
    %365 = vector.shape_cast %362 : vector<4x256xf32> to vector<1x4x256xf32>
    tpu.vector_store %arg3[%c0_156, %c0_157, %c0_158], %365 {strides = array<i32>} : memref<1x4x256xf32, #tpu.memory_space<vmem>>, vector<1x4x256xf32>,
    return
  }
  func.func @transform_0(%arg0: i32) -> (i32, i32) {
    %c0_i32 = arith.constant 0 : i32
    %c0_i32_0 = arith.constant 0 : i32
    %c0_i32_1 = arith.constant 0 : i32
    return %c0_i32, %c0_i32_0 : i32, i32
  }
  func.func @transform_1(%arg0: i32) -> (i32, i32, i32) {
    %c0_i32 = arith.constant 0 : i32
    %c0_i32_0 = arith.constant 0 : i32
    %c0_i32_1 = arith.constant 0 : i32
    return %arg0, %c0_i32, %c0_i32_0 : i32, i32, i32
  }
  func.func @transform_2(%arg0: i32) -> (i32, i32, i32) {
    %c0_i32 = arith.constant 0 : i32
    %c0_i32_0 = arith.constant 0 : i32
    %c0_i32_1 = arith.constant 0 : i32
    return %arg0, %c0_i32, %c0_i32_0 : i32, i32, i32
  }
}

</mosaic_0001>

<bundles_post_ra>
// kernel: tpu_custom_call.1
= control target key start
LH: loop header
LB: loop body
LE: loop exit
PB: predicated region body
PF: predicated region fallthrough
CT: control target
= control target key end

     0   :  { %7 = vsyncpa [#allocation4], 0  ;;  %s3219_s0 = inlined_call_operand.hbm [shape: f32[2,49], index: 0, kind: input, shape index: {}]   ;;  %s3220_s1 = inlined_call_operand.hbm [shape: f32[2,4,256], index: 1, kind: input, shape index: {}]   ;;  %s3221_s2 = inlined_call_operand.hbm [shape: f32[2,4,256], index: 2, kind: output, shape index: {}]  }
   0x1   :  { %8 = vsyncpa [#allocation7], 0 }
   0x2   :  { %10 = vsyncpa [#allocation7 + $0x1], 0 }
   0x3   :  { %11 = vsyncpa [#allocation5], 0 }
   0x4   :  { %13 = vsyncpa [#allocation5 + $0x1], 0  ;;  %s2337_s9 = smov 0   ;;  %s2339_s10 = smov 0  }
   0x5   :  { %s2341_s11 = smov 0   ;;  %s2343_s12 = smov 0  }
   0x6 LB: > { %s2358_s13 = sadd.s32 4294967295, %s2220_s12   ;;  %s1857_s14 = sadd.s32 4294967294, %s2220_s12   ;;  %s2220_s12 = sphi %s2343_s12, %s3281_s12   ;;  %s2216_s11 = sphi %s2341_s11, %s3280_s11   ;;  %s2212_s10 = sphi %s2339_s10, %s3279_s10   ;;  %s2208_s9 = sphi %s2337_s9, %s3278_s9  }
   0x7   : > { %p60_p0 = scmp.ne.s32.totalorder %s2212_s10, %s2208_s9  ;;  %p61_p1 = scmp.eq.s32.totalorder %s2358_s13, 0 }
   0x8   : > { %p84_p2 = scmp.eq.s32.totalorder %s2358_s13, 1  ;;  %p90_p3 = scmp.eq.s32.totalorder %s1857_s14, 1 }
   0x9   : > { %p2367_p4 = por %p61_p1, %p60_p0  ;;  %p1858_p5 = scmp.ge.s32.totalorder %s2220_s12, 1 }
   0xa   : > { %p2372_p6 = por %p90_p3, %p60_p0  ;;  %p97_p7 = scmp.lt.s32.totalorder %s2220_s12, 3 }
   0xb   : > { %s109_s19 = sshll.u32 %s3219_s0, 4  ;;  %s2222_s21 = smov [#allocation3]   ;;  %s110_s19 = int_to_ptr.hbm [resolvable:$true] %s109_s19 }
   0xc   : > { %p2380_p8 = pnand %p1858_p5, %p97_p7  ;;  %s111_s22 = sshll.u32 %s2222_s21, 4  ;;  %s112_s22 = int_to_ptr.vmem [resolvable:$true] %s111_s22 }
   0xd   : > { %s2390_s23 = sadd.s32 1, %s2220_s12   ;;  %s47_s24 = sadd.s32 1, %s2216_s11 }
   0xe   : > { %p1885_p10 = pneg %p2380_p8  ;;  %s44_s25 = ssub.s32 %s2220_s12, %s2390_s23 }
   0xf   : > { %p45_p12 = scmp.eq.s32.totalorder %s44_s25, 0  ;;  %p54_p13 = scmp.ne.s32.totalorder %s2216_s11, %s2212_s10 }
  0x10   : > { %p1886_p11 = pnand %p1885_p10, %p61_p1  ;;  %p55_p0 = scmp.eq.s32.totalorder %s2220_s12, 0 }
  0x11   : > { %s2399_s26 = scalar_select %p45_p12, %s2216_s11, %s47_s24  }
  0x12   : > { %1888 = dma.hbm_to_vmem [thread:$0]  (!%p1886_p11), %s110_s19, 32, %s112_s22, [#allocation4]  }
  0x13   : > { %p2403_p3 = por %p84_p2, %p54_p13  ;;  %p1898_p5 = scmp.lt.s32.totalorder %s2220_s12, 2 }
  0x14   : > { %s122_s28 = sand.u32 1, %s2216_s11   ;;  %s1875_s29 = sshll.u32 %s2220_s12, 3 }
  0x15   : > { %p56_p7 = por %p55_p0, %p54_p13  ;;  %s1861_s30 = sshll.u32 %s122_s28, 3 }
  0x16   : > { %s131_s5 = scalar_lea.hbm %s3220_s1, %s1875_s29  ;;  %s126_s7 = scalar_lea.vmem [#allocation6], %s1861_s30 }
  0x17   : > { %s133_s6 = sshll.u32 %s131_s5, 4  ;;  %s135_s8 = sshll.u32 %s126_s7, 4  ;;  %s134_s6 = int_to_ptr.hbm [resolvable:$true] %s133_s6  ;;  %s136_s8 = int_to_ptr.vmem [resolvable:$true] %s135_s8 }
  0x18   : > { %p2413_p10 = pnand %p1898_p5, %p56_p7  ;;  %s123_s17 = scalar_lea.sflag [#allocation7], %s122_s28 }
  0x19   : > { %s2120_s18 = sshra.s32 %s134_s6, 4  ;;  %s2127_s24 = scalar_lea.hbm %s3220_s1, 16  ;;  %s2121_s18 = int_to_ptr.hbm [resolvable:$true] %s2120_s18 }
  0x1a   : > { %s2122_s19 = scalar_lea.hbm %s2121_s18, 8  ;;  %p2124_p11 = pneg %p2413_p10 }
  0x1b   : > { %p2123_p2 = scmp.ne.s32.totalorder %s2121_s18, %s2122_s19  ;;  %p2128_p0 = scmp.lt.s32.totalorder %s2121_s18, %s3220_s1 }
  0x1c   : > { %p2129_p5 = scmp.lt.s32.totalorder %s2127_s24, %s2122_s19 }
  0x1d   : > { %p2125_p12 = pnand %p2124_p11, %p2123_p2 }
  0x1e   : > { %p2130_p7 = por %p2129_p5, %p2128_p0 }
  0x1f   : > { %p2126_p13 = pneg %p2125_p12 }
  0x21   : > { %p2131_p9 = pnand %p2130_p7, %p2126_p13 }
  0x23   : > { %2134 = shalt.err (!%p2131_p9)
}
  0x24   : > { %1892 = dma.hbm_to_vmem [thread:$0]  (!%p2413_p10), %s134_s6, 128, %s136_s8, %s123_s17  }
  0x25   : > { %144 = sbr.rel (%p2380_p8) target bundleno = 964 (0x3c4), region = 28 }
  0x2a   : > { %2195 = dma.done.wait (%p61_p1), [#allocation4], 32  }
  0x2b   : > { %2197 = vsyncadd (%p61_p1), [#allocation4], 4294967264  ;;  %s2434_s28 = sand.u32 1, %s2212_s10  }
  0x2c   : > { %s1866_s30 = sshll.u32 %s2434_s28, 3  ;;  %s152_s3 = scalar_lea.sflag [#allocation7], %s2434_s28 }
  0x2d   : > { %s155_s4 = scalar_lea.vmem [#allocation6], %s1866_s30 }
  0x2e   : > { %2199 = dma.done.wait (%p2367_p4), %s152_s3, 128  }
  0x2f   : > { %2201 = vsyncadd (%p2367_p4), %s152_s3, 4294967168  ;;  %v2223_v0 = vmov 7   ;;  %v306_v1 = vld [vmem:[#allocation3] sm:$0x3]  ;;  %v2444_v2 = vld [vmem:[%s155_s4] sm:$0xff]  ;;  %v2224_v4 = vmov 14  }
  0x30   : > { %2034 = vset.pattern.permute.xlu0 %v2223_v0  ;;  %3242 = vst [vmem:[#allocation12_spill] sm:$0xff] %v2444_v2  ;;  %v333_v3 = vld [vmem:[#allocation3] sm:$0x3]  ;;  %2035 = vset.pattern.permute.xlu2 %v2224_v4  ;;  %vm184_vm0 = vcmask 1043456   ;;  %v2225_v8 = vmov 21   ;;  %v2226_v16 = vmov 28  }
  0x31   : > { %309 = vperm.xlu0 %2034, %v306_v1   ;;  %179 = vst [vmem:[#allocation1] ss:$2 sm:$0xff] %v2444_v2  ;;  %336 = vperm.xlu2 %2035, %v333_v3   ;;  %v360_v5 = vld [vmem:[#allocation3] sm:$0x3]  ;;  %v2227_v29 = vmov 35   ;;  %v2228_v39 = vmov 42  }
  0x32   : > { %v387_v13 = vld [vmem:[#allocation3] sm:$0x3]  ;;  %vm227_vm1 = vcmask 1040384   ;;  %s2229_s15 = smov 56   ;;  %v2230_v50 = vmov 8   ;;  %v2231_v54 = vmov 22  }
  0x33   : > { %v441_v34 = vld [vmem:[#allocation3] sm:$0x3]  ;;  %v2232_v56 = vmov 36   ;;  %v2233_v57 = vmov 1   ;;  %v2234_v60 = vmov 15   ;;  %v2235_v61 = vmov 2  }
  0x34   : > { %v509_v48 = vld [vmem:[#allocation3] sm:$0x3]  ;;  %vm220_vm2 = vcmask 451584   ;;  %v2236_v0 = vmov 29   ;;  %vm222_vm3 = vcmask 910784   ;;  %v2237_v1 = vmov 0.0  }
  0x35   : > { %v563_v52 = vld [vmem:[#allocation3] sm:$0x3]  ;;  %221 = vst.msk [vmem:[#allocation2] sm:$0x3] %vm220_vm2, %v2237_v1  ;;  %v2238_v3 = vmov 16   ;;  %vm232_vm6 = vcmask 457728  }
  0x36   : > { %v414_v53 = vld [vmem:[#allocation3] sm:$0x3]  ;;  %223 = vst.msk [vmem:[#allocation2 + $0x4] sm:$0x3] %vm222_vm3, %v2237_v1  ;;  %s2248_s20 = smov 123   ;;  %s2249_s5 = smov 107  }
  0x37   : > { %v482_v55 = vld [vmem:[#allocation3] sm:$0x3]  ;;  %s2250_s6 = smov 91   ;;  %s2251_s7 = smov 75   ;;  %vm323_vm8 = vcmask 875520   ;;  %vm350_vm9 = vcmask 744448  }
  0x38   : > { %v180_v6 = vld.sshfl [vmem:[#allocation1] sm:$0xff pattern:$0x75316420]  ;;  %v181_v7 = vld.sshfl [vmem:[#allocation1 + $0x8] sm:$0xff pattern:$0x75316420] }
  0x39   : > { %2036 = vset.pattern.permute.xlu0 %v2225_v8  ;;  %v185_v9 = vsel %vm184_vm0, %v180_v6, 0.0  ;;  %v192_v10 = vsel %vm184_vm0, %v181_v7, 0.0  ;;  %201 = vst [vmem:[#allocation1] ss:$2 sm:$0xff] %v2444_v2  ;;  %2037 = vset.pattern.permute.xlu2 %v2226_v16  ;;  %v617_v58 = vld [vmem:[#allocation3] sm:$0x3] }
  0x3a   : > { %363 = vperm.xlu0 %2036, %v360_v5   ;;  %v186_v11 = vrot.slane %v185_v9, 4  ;;  %v193_v12 = vrot.slane %v192_v10, 4  ;;  %390 = vperm.xlu2 %2037, %v387_v13   ;;  %v536_v59 = vld [vmem:[#allocation3] sm:$0x3]  ;;  %v2239_v5 = vmov 43   ;;  %v2240_v7 = vmov 30  }
  0x3b   : > { %v685_v62 = vld [vmem:[#allocation3] sm:$0x3]  ;;  %v2242_v13 = vmov 9   ;;  %s2254_s8 = smov 59   ;;  %s2255_s14 = smov 27   ;;  %vm296_vm10 = vcmask 1006592  }
  0x3c   : > { %v187_v14 = vadd.f32 %v186_v11, %v185_v9  ;;  %v194_v15 = vadd.f32 %v193_v12, %v192_v10  ;;  %v590_v63 = vld [vmem:[#allocation3] sm:$0x3]  ;;  %v2241_v10 = vmov 0   ;;  %s2256_s17 = smov 43   ;;  %s2258_s18 = smov 106   ;;  %vm377_vm11 = vcmask 613376  }
  0x3d   : > { %v739_v4 = vld [vmem:[#allocation3] sm:$0x3]  ;;  %2033 = vset.pattern.permute.xlu1 %v2241_v10  ;;  %s2259_s19 = smov 122   ;;  %s2261_s21 = smov 74   ;;  %vm404_vm12 = vcmask 482304   ;;  %vm431_vm13 = vcmask 351232  }
  0x3e   : > { %v188_v17 = vrot.slane %v187_v14, 2  ;;  %v195_v18 = vrot.slane %v194_v15, 2  ;;  %v644_v6 = vld [vmem:[#allocation3] sm:$0x3]  ;;  %s2262_s22 = smov 90   ;;  %s2264_s24 = smov 42  }
  0x3f   : > { %v793_v8 = vld [vmem:[#allocation3] sm:$0x3]  ;;  %s2265_s25 = smov 58   ;;  %s2267_s29 = smov 121   ;;  %vm458_vm14 = vcmask 220160   ;;  %vm526_vm15 = vcmask 867328  }
  0x40   : > { %v189_v19 = vadd.f32 %v188_v17, %v187_v14  ;;  %v196_v20 = vadd.f32 %v195_v18, %v194_v15  ;;  %v202_v21 = vld.sshfl [vmem:[#allocation1] sm:$0xff pattern:$0x75316420]  ;;  %v203_v22 = vld.sshfl [vmem:[#allocation1 + $0x8] sm:$0xff pattern:$0x75316420]  ;;  %v3222_v18 = vlaneseq }
  0x41   : > { %v206_v23 = vsel %vm184_vm0, %v202_v21, -inf  ;;  %v213_v24 = vsel %vm184_vm0, %v203_v22, -inf  ;;  %v279_v11 = vld [vmem:[#allocation3] sm:$0x3]  ;;  %v2243_v15 = vmov 44   ;;  %s2268_s3 = smov 26  }
  0x42   : > { %v190_v25 = vrot.slane %v189_v19, 1  ;;  %v197_v26 = vrot.slane %v196_v20, 1  ;;  %v207_v27 = vrot.slane %v206_v23, 4  ;;  %v214_v28 = vrot.slane %v213_v24, 4  ;;  %2038 = vset.pattern.permute.xlu0 %v2227_v29  ;;  %2039 = vset.pattern.permute.xlu2 %v2228_v39  ;;  %v712_v12 = vld [vmem:[#allocation3] sm:$0x3] }
  0x43   : > { %444 = vperm.xlu2 %2039, %v441_v34   ;;  %282 = vperm.xlu1 %2033, %v279_v11   ;;  %v847_v14 = vld [vmem:[#allocation3] sm:$0x3]  ;;  %vm2461_vm4 = vcmp.ge.s32.totalorder %v3222_v18, 56  ;;  %vm237_vm5 = vcmp.lt.s32.totalorder %v3222_v18, 312  ;;  %v2246_v29 = vmov 10   ;;  %s2270_s4 = smov 89  }
  0x44   : > { %v191_v30 = vadd.f32 %v190_v25, %v189_v19  ;;  %v198_v31 = vadd.f32 %v197_v26, %v196_v20  ;;  %v208_v32 = vmax.f32 %v206_v23, %v207_v27  ;;  %v215_v33 = vmax.f32 %v213_v24, %v214_v28  ;;  %v766_v17 = vld [vmem:[#allocation3] sm:$0x3]  ;;  %vm238_vm7 = vmand %vm2461_vm4, %vm237_vm5 }
  0x45   : > { %v2244_v19 = vmov 23   ;;  %v820_v23 = vld [vmem:[#allocation3] sm:$0x3]  ;;  %v2245_v25 = vmov 37   ;;  %v2257_v20 = vmov 31   ;;  %vm553_vm2 = vcmask 736256  }
  0x46   : > { %v199_v35 = vmul.f32 0.25, %v191_v30  ;;  %v200_v36 = vmul.f32 0.25, %v198_v31  ;;  %v209_v37 = vrot.slane %v208_v32, 2  ;;  %v216_v38 = vrot.slane %v215_v33, 2  ;;  %v969_v11 = vld [vmem:[#allocation3] sm:$0x3] }
  0x47   : > { %v2247_v30 = vmov 3   ;;  %vm580_vm3 = vcmask 605184   ;;  %vm607_vm4 = vcmask 474112   ;;  %vm634_vm5 = vcmask 343040  }
  0x48   : > { %v226_v40 = vrot.slane %v200_v36, 7  ;;  %v210_v41 = vmax.f32 %v208_v32, %v209_v37  ;;  %v217_v42 = vmax.f32 %v215_v33, %v216_v38 }
  0x4a   : > { %v228_v43 = vsel %vm227_vm1, %v199_v35, %v226_v40  ;;  %v211_v44 = vrot.slane %v210_v41, 1  ;;  %v218_v45 = vrot.slane %v217_v42, 1 }
  0x4b   : > { %229 = vrot.lane.b32.xlu0 %v228_v43, %s2229_s15  ;;  %2041 = vset.pattern.permute.xlu2 %v2230_v50 }
  0x4c   : > { %v212_v46 = vmax.f32 %v210_v41, %v211_v44  ;;  %v219_v47 = vmax.f32 %v217_v42, %v218_v45  ;;  %512 = vperm.xlu2 %2041, %v509_v48   ;;  %v915_v48 = vld [vmem:[#allocation3] sm:$0x3] }
  0x4e   : > { %v242_v49 = vrot.slane %v219_v47, 7 }
  0x50   : > { %v243_v51 = vsel %vm227_vm1, %v212_v46, %v242_v49  ;;  %v888_v49 = vld [vmem:[#allocation3] sm:$0x3]  ;;  %vm499_vm1 = vcmask 998400  }
  0x53   : > { %244 = vrot.lane.b32.xlu0 %v243_v51, %s2229_s15 }
  0x54   : > { %2043 = vset.pattern.permute.xlu2 %v2231_v54 }
  0x55   : > { %566 = vperm.xlu2 %2043, %v563_v52  }
  0x5b   : > { %417 = vperm.xlu0 %2038, %v414_v53  }
  0x5d   : > { %2045 = vset.pattern.permute.xlu2 %v2232_v56  ;;  %v2253_v56 = vmov 17  }
  0x5e   : > { %620 = vperm.xlu2 %2045, %v617_v58  }
  0x63   : > { %2040 = vset.pattern.permute.xlu0 %v2233_v57 }
  0x64   : > { %485 = vperm.xlu0 %2040, %v482_v55   ;;  %v2252_v55 = vmov 24  }
  0x66   : > { %2047 = vset.pattern.permute.xlu2 %v2235_v61 }
  0x67   : > { %688 = vperm.xlu2 %2047, %v685_v62  }
  0x6c   : > { %2042 = vset.pattern.permute.xlu0 %v2234_v60 }
  0x6d   : > { %539 = vperm.xlu0 %2042, %v536_v59  }
  0x6f   : > { %2049 = vset.pattern.permute.xlu2 %v2238_v3 }
  0x70   : > { %742 = vperm.xlu2 %2049, %v739_v4  }
  0x75   : > { %2044 = vset.pattern.permute.xlu0 %v2236_v0 }
  0x76   : > { %593 = vperm.xlu0 %2044, %v590_v63  }
  0x78   : > { %2051 = vset.pattern.permute.xlu2 %v2240_v7 }
  0x79   : > { %796 = vperm.xlu2 %2051, %v793_v8   ;;  %v942_v8 = vld [vmem:[#allocation3] sm:$0x3] }
  0x7e   : > { %2046 = vset.pattern.permute.xlu0 %v2239_v5 }
  0x7f   : > { %647 = vperm.xlu0 %2046, %v644_v6  }
  0x81   : > { %2053 = vset.pattern.permute.xlu2 %v2243_v15 }
  0x82   : > { %850 = vperm.xlu2 %2053, %v847_v14  }
  0x87   : > { %2048 = vset.pattern.permute.xlu0 %v2242_v13 }
  0x88   : > { %715 = vperm.xlu0 %2048, %v712_v12  }
  0x8a   : > { %2055 = vset.pattern.permute.xlu2 %v2246_v29 }
  0x8b   : > { %v2470_v31 = vpop.permute.xlu2 %336 }
  0x90   : > { %2050 = vset.pattern.permute.xlu0 %v2244_v19 }
  0x91   : > { %769 = vperm.xlu0 %2050, %v766_v17  }
  0x94   : > { %v2472_v37 = vpop.permute.xlu2 %390 }
  0x95   : > { %3246 = vst [vmem:[#allocation14_spill] sm:$0xff] %v2472_v37 }
  0x99   : > { %2052 = vset.pattern.permute.xlu0 %v2245_v25 }
  0x9a   : > { %823 = vperm.xlu0 %2052, %v820_v23  }
  0x9d   : > { %v2474_v42 = vpop.permute.xlu2 %444 }
  0x9e   : > { %3247 = vst [vmem:[#allocation15_spill] sm:$0xff] %v2474_v42 }
  0xa2   : > { %2054 = vset.pattern.permute.xlu0 %v2247_v30 }
  0xa3   : > { %v2456_v9 = vpop.permute.xlu0 %309 }
  0xa6   : > { %v2476_v47 = vpop.permute.xlu2 %512 }
  0xac   : > { %v2458_v16 = vpop.permute.xlu0 %363 }
  0xad   : > { %3243 = vst [vmem:[#allocation13_spill] sm:$0xff] %v2458_v16 }
  0xaf   : > { %v2478_v54 = vpop.permute.xlu2 %566 }
  0xb8   : > { %v2480_v61 = vpop.permute.xlu2 %620 }
  0xbd   : > { %v230_v21 = vpop.permute.xlu0 %229 }
  0xbe   : > { %v231_v22 = vrot.slane %v230_v21, 7 }
  0xc0   : > { %v233_v24 = vsel %vm232_vm6, %v231_v22, %v230_v21 }
  0xc1   : > { %239 = vst.msk [vmem:[#allocation2] ss:$2 sm:$0x7] %vm238_vm7, %v233_v24  ;;  %v2482_v3 = vpop.permute.xlu2 %688 }
  0xc5   : > { %v245_v26 = vpop.permute.xlu0 %244 }
  0xc6   : > { %v246_v27 = vrot.slane %v245_v26, 7 }
  0xc8   : > { %v247_v28 = vsel %vm232_vm6, %v246_v27, %v245_v26 }
  0xc9   : > { %250 = vst.msk [vmem:[#allocation2 + $0x1] ss:$2 sm:$0x7] %vm238_vm7, %v247_v28  ;;  %vm661_vm7 = vcmask 211968  }
  0xca   : > { %v2484_v10 = vpop.permute.xlu2 %742 }
  0xcd   : > { %v2486_v17 = vpop.permute.xlu0 %417 }
  0xce   : > { %3248 = vst [vmem:[#allocation16_spill] sm:$0xff] %v2486_v17 }
  0xd0   : > { %v278_v32 = vld [vmem:[#allocation2] sm:$0x3f] }
  0xd1   : > { %286 = vst [vmem:[#allocation1] ss:$4 sm:$0xff] %v278_v32  ;;  %v305_v36 = vld [vmem:[#allocation2] sm:$0x3f] }
  0xd2   : > { %v332_v41 = vld [vmem:[#allocation2] sm:$0x3f] }
  0xd3   : > { %v359_v46 = vld [vmem:[#allocation2] sm:$0x3f]  ;;  %v2488_v19 = vpop.permute.xlu2 %796 }
  0xd4   : > { %v386_v53 = vld [vmem:[#allocation2] sm:$0x3f] }
  0xd5   : > { %v413_v60 = vld [vmem:[#allocation2] sm:$0x3f] }
  0xd6   : > { %v440_v1 = vld [vmem:[#allocation2] sm:$0x3f]  ;;  %v2491_v25 = vpop.permute.xlu0 %485 }
  0xd7   : > { %v481_v7 = vld [vmem:[#allocation2] sm:$0x3f] }
  0xd8   : > { %v288_v33 = vld.sshfl [vmem:[#allocation1 + $0x8] sm:$0xff pattern:$0x73625140]  ;;  %v287_v34 = vld.sshfl [vmem:[#allocation1] sm:$0xff pattern:$0x73625140] }
  0xd9   : > { %292 = vrot.lane.b32.xlu2 %v288_v33, %s2248_s20  ;;  %290 = vrot.lane.b32.xlu1 %v287_v34, %s2248_s20  ;;  %v289_v35 = vld.sshfl [vmem:[#allocation1 + $0x10] sm:$0xff pattern:$0x73625140]  ;;  %v508_v15 = vld [vmem:[#allocation2] sm:$0x3f]  ;;  %v2260_v33 = vmov 38  }
  0xda   : > { %313 = vst [vmem:[#allocation1] ss:$4 sm:$0xff] %v305_v36  ;;  %v535_v24 = vld [vmem:[#allocation2] sm:$0x3f] }
  0xdb   : > { %v562_v30 = vld [vmem:[#allocation2] sm:$0x3f] }
  0xdc   : > { %v2493_v28 = vpop.permute.xlu2 %850 }
  0xdd   : > { %3249 = vst [vmem:[#allocation17_spill] sm:$0xff] %v2493_v28 }
  0xdf   : > { %v2495_v32 = vpop.permute.xlu0 %539 }
  0xe1   : > { %294 = vrot.lane.b32.xlu2 %v289_v35, %s2248_s20  ;;  %v314_v38 = vld.sshfl [vmem:[#allocation1] sm:$0xff pattern:$0x73625140]  ;;  %v315_v39 = vld.sshfl [vmem:[#allocation1 + $0x8] sm:$0xff pattern:$0x73625140] }
  0xe2   : > { %317 = vrot.lane.b32.xlu1 %v314_v38, %s2249_s5  ;;  %v316_v40 = vld.sshfl [vmem:[#allocation1 + $0x10] sm:$0xff pattern:$0x73625140]  ;;  %v589_v38 = vld [vmem:[#allocation2] sm:$0x3f]  ;;  %s2271_s20 = smov 105  }
  0xe3   : > { %340 = vst [vmem:[#allocation1] ss:$4 sm:$0xff] %v332_v41  ;;  %v996_v41 = vld [vmem:[#allocation3] sm:$0x3] }
  0xe9   : > { %319 = vrot.lane.b32.xlu2 %v315_v39, %s2249_s5 }
  0xea   : > { %321 = vrot.lane.b32.xlu1 %v316_v40, %s2249_s5  ;;  %v341_v43 = vld.sshfl [vmem:[#allocation1] sm:$0xff pattern:$0x73625140]  ;;  %v342_v44 = vld.sshfl [vmem:[#allocation1 + $0x8] sm:$0xff pattern:$0x73625140]  ;;  %v2501_v40 = vpop.permute.xlu0 %593 }
  0xeb   : > { %344 = vrot.lane.b32.xlu0 %v341_v43, %s2250_s6  ;;  %v343_v45 = vld.sshfl [vmem:[#allocation1 + $0x10] sm:$0xff pattern:$0x73625140]  ;;  %s2272_s5 = smov 57  }
  0xec   : > { %367 = vst [vmem:[#allocation1] ss:$4 sm:$0xff] %v359_v46 }
  0xf1   : > { %918 = vperm.xlu2 %2055, %v915_v48   ;;  %v616_v48 = vld [vmem:[#allocation2] sm:$0x3f] }
  0xf2   : > { %346 = vrot.lane.b32.xlu1 %v342_v44, %s2250_s6 }
  0xf3   : > { %891 = vperm.xlu0 %2054, %v888_v49   ;;  %v368_v50 = vld.sshfl [vmem:[#allocation1] sm:$0xff pattern:$0x73625140]  ;;  %v369_v51 = vld.sshfl [vmem:[#allocation1 + $0x8] sm:$0xff pattern:$0x73625140] }
  0xf4   : > { %v370_v52 = vld.sshfl [vmem:[#allocation1 + $0x10] sm:$0xff pattern:$0x73625140]  ;;  %v1022_v49 = vld [vmem:[#allocation3] sm:$0x3] }
  0xf5   : > { %394 = vst [vmem:[#allocation1] ss:$4 sm:$0xff] %v386_v53  ;;  %v2263_v53 = vmov 45  }
  0xf9   : > { %348 = vrot.lane.b32.xlu2 %v343_v45, %s2250_s6  ;;  %s2274_s6 = smov 73  }
  0xfa   : > { %371 = vrot.lane.b32.xlu1 %v368_v50, %s2251_s7  ;;  %2057 = vset.pattern.permute.xlu2 %v2252_v55  ;;  %v2506_v50 = vpop.permute.xlu0 %647 }
  0xfb   : > { %2056 = vset.pattern.permute.xlu0 %v2253_v56 }
  0xfc   : > { %v395_v57 = vld.sshfl [vmem:[#allocation1] sm:$0xff pattern:$0x73625140]  ;;  %v397_v58 = vld.sshfl [vmem:[#allocation1 + $0x10] sm:$0xff pattern:$0x73625140] }
  0xfd   : > { %398 = vrot.lane.b32.xlu0 %v395_v57, %s2254_s8  ;;  %v396_v59 = vld.sshfl [vmem:[#allocation1 + $0x8] sm:$0xff pattern:$0x73625140] }
  0xfe   : > { %421 = vst [vmem:[#allocation1] ss:$4 sm:$0xff] %v413_v60 }
 0x101   : > { %373 = vrot.lane.b32.xlu2 %v369_v51, %s2251_s7  ;;  %v2508_v51 = vpop.permute.xlu1 %282 }
 0x102   : > { %375 = vrot.lane.b32.xlu1 %v370_v52, %s2251_s7  ;;  %s2276_s7 = smov 25  }
 0x105   : > { %v422_v62 = vld.sshfl [vmem:[#allocation1] sm:$0xff pattern:$0x73625140]  ;;  %v423_v63 = vld.sshfl [vmem:[#allocation1 + $0x8] sm:$0xff pattern:$0x73625140] }
 0x106   : > { %v424_v0 = vld.sshfl [vmem:[#allocation1 + $0x10] sm:$0xff pattern:$0x73625140] }
 0x107   : > { %448 = vst [vmem:[#allocation1] ss:$4 sm:$0xff] %v440_v1 }
 0x109   : > { %402 = vrot.lane.b32.xlu2 %v397_v58, %s2254_s8  ;;  %v643_v58 = vld [vmem:[#allocation2] sm:$0x3f] }
 0x10a   : > { %400 = vrot.lane.b32.xlu1 %v396_v59, %s2254_s8  ;;  %v2514_v59 = vpop.permute.xlu0 %715  ;;  %s2277_s8 = smov 104  }
 0x10e   : > { %v449_v4 = vld.sshfl [vmem:[#allocation1] sm:$0xff pattern:$0x73625140]  ;;  %v450_v5 = vld.sshfl [vmem:[#allocation1 + $0x8] sm:$0xff pattern:$0x73625140] }
 0x10f   : > { %v451_v6 = vld.sshfl [vmem:[#allocation1 + $0x10] sm:$0xff pattern:$0x73625140]  ;;  %452 = vrot.lane.b32.xlu0 %v449_v4, %s2255_s14  ;;  %v684_v4 = vld [vmem:[#allocation2] sm:$0x3f] }
 0x110   : > { %489 = vst [vmem:[#allocation1] ss:$4 sm:$0xff] %v481_v7 }
 0x111   : > { %427 = vrot.lane.b32.xlu2 %v423_v63, %s2256_s17 }
 0x112   : > { %425 = vrot.lane.b32.xlu1 %v422_v62, %s2256_s17  ;;  %v2525_v7 = vpop.permute.xlu0 %769 }
 0x117   : > { %v490_v12 = vld.sshfl [vmem:[#allocation1] sm:$0xff pattern:$0x73625140]  ;;  %v491_v13 = vld.sshfl [vmem:[#allocation1 + $0x8] sm:$0xff pattern:$0x73625140]  ;;  %945 = vperm.xlu0 %2056, %v942_v8  }
 0x118   : > { %v492_v14 = vld.sshfl [vmem:[#allocation1 + $0x10] sm:$0xff pattern:$0x73625140] }
 0x119   : > { %972 = vperm.xlu2 %2057, %v969_v11   ;;  %516 = vst [vmem:[#allocation1] ss:$4 sm:$0xff] %v508_v15 }
 0x11a   : > { %429 = vrot.lane.b32.xlu1 %v424_v0, %s2256_s17  ;;  %s2281_s17 = smov 72  }
 0x11f   : > { %2058 = vset.pattern.permute.xlu0 %v2257_v20  ;;  %v1049_v20 = vld [vmem:[#allocation3] sm:$0x3] }
 0x120   : > { %v517_v21 = vld.sshfl [vmem:[#allocation1] sm:$0xff pattern:$0x73625140]  ;;  %v518_v22 = vld.sshfl [vmem:[#allocation1 + $0x8] sm:$0xff pattern:$0x73625140] }
 0x121   : > { %v519_v23 = vld.sshfl [vmem:[#allocation1 + $0x10] sm:$0xff pattern:$0x73625140]  ;;  %520 = vrot.lane.b32.xlu0 %v517_v21, %s2258_s18  ;;  %456 = vrot.lane.b32.xlu2 %v451_v6, %s2255_s14  ;;  %v2266_v6 = vmov 4  }
 0x122   : > { %543 = vst [vmem:[#allocation1] ss:$4 sm:$0xff] %v535_v24  ;;  %454 = vrot.lane.b32.xlu1 %v450_v5, %s2255_s14  ;;  %2059 = vset.pattern.permute.xlu2 %v2260_v33  ;;  %v1090_v33 = vld [vmem:[#allocation3] sm:$0x3]  ;;  %s2278_s14 = smov 41  }
 0x129   : > { %v544_v26 = vld.sshfl [vmem:[#allocation1] sm:$0xff pattern:$0x73625140]  ;;  %v545_v27 = vld.sshfl [vmem:[#allocation1 + $0x8] sm:$0xff pattern:$0x73625140]  ;;  %495 = vrot.lane.b32.xlu2 %v491_v13, %s2259_s19 }
 0x12a   : > { %v546_v29 = vld.sshfl [vmem:[#allocation1 + $0x10] sm:$0xff pattern:$0x73625140]  ;;  %493 = vrot.lane.b32.xlu1 %v490_v12, %s2259_s19 }
 0x12b   : > { %570 = vst [vmem:[#allocation1] ss:$4 sm:$0xff] %v562_v30 }
 0x131   : > { %524 = vrot.lane.b32.xlu2 %v519_v23, %s2258_s18 }
 0x132   : > { %v571_v34 = vld.sshfl [vmem:[#allocation1] sm:$0xff pattern:$0x73625140]  ;;  %v572_v35 = vld.sshfl [vmem:[#allocation1 + $0x8] sm:$0xff pattern:$0x73625140]  ;;  %497 = vrot.lane.b32.xlu1 %v492_v14, %s2259_s19 }
 0x133   : > { %v573_v36 = vld.sshfl [vmem:[#allocation1 + $0x10] sm:$0xff pattern:$0x73625140]  ;;  %574 = vrot.lane.b32.xlu0 %v571_v34, %s2261_s21  ;;  %v2499_v39 = vpop.permute.xlu2 %292  ;;  %v711_v14 = vld [vmem:[#allocation2] sm:$0x3f]  ;;  %v2269_v34 = vmov 11  }
 0x134   : > { %597 = vst [vmem:[#allocation1] ss:$4 sm:$0xff] %v589_v38  ;;  %s2283_s19 = smov 40  }
 0x139   : > { %549 = vrot.lane.b32.xlu2 %v545_v27, %s2262_s22  ;;  %v738_v27 = vld [vmem:[#allocation2] sm:$0x3f] }
 0x13a   : > { %522 = vrot.lane.b32.xlu1 %v518_v22, %s2258_s18  ;;  %v2535_v22 = vpop.permute.xlu0 %823  ;;  %s2282_s18 = smov 120  }
 0x13b   : > { %999 = vperm.xlu0 %2058, %v996_v41   ;;  %v598_v43 = vld.sshfl [vmem:[#allocation1] sm:$0xff pattern:$0x73625140]  ;;  %v599_v44 = vld.sshfl [vmem:[#allocation1 + $0x8] sm:$0xff pattern:$0x73625140]  ;;  %v2504_v45 = vpop.permute.xlu2 %294 }
 0x13c   : > { %v600_v46 = vld.sshfl [vmem:[#allocation1 + $0x10] sm:$0xff pattern:$0x73625140] }
 0x13d   : > { %624 = vst [vmem:[#allocation1] ss:$4 sm:$0xff] %v616_v48 }
 0x141   : > { %1025 = vperm.xlu2 %2059, %v1022_v49  }
 0x142   : > { %547 = vrot.lane.b32.xlu1 %v544_v26, %s2262_s22 }
 0x143   : > { %v2510_v52 = vpop.permute.xlu2 %319  ;;  %2060 = vset.pattern.permute.xlu0 %v2263_v53 }
 0x144   : > { %v625_v55 = vld.sshfl [vmem:[#allocation1] sm:$0xff pattern:$0x73625140]  ;;  %v626_v56 = vld.sshfl [vmem:[#allocation1 + $0x8] sm:$0xff pattern:$0x73625140] }
 0x145   : > { %v627_v57 = vld.sshfl [vmem:[#allocation1 + $0x10] sm:$0xff pattern:$0x73625140]  ;;  %628 = vrot.lane.b32.xlu0 %v625_v55, %s2264_s24 }
 0x146   : > { %651 = vst [vmem:[#allocation1] ss:$4 sm:$0xff] %v643_v58 }
 0x149   : > { %578 = vrot.lane.b32.xlu2 %v573_v36, %s2261_s21 }
 0x14a   : > { %551 = vrot.lane.b32.xlu1 %v546_v29, %s2262_s22  ;;  %2061 = vset.pattern.permute.xlu2 %v2266_v6  ;;  %s2286_s22 = smov 119  }
 0x14b   : > { %v2516_v60 = vpop.permute.xlu1 %290  ;;  %v2518_v62 = vpop.permute.xlu2 %918 }
 0x14c   : > { %3250 = vst [vmem:[#allocation18_spill] sm:$0xff] %v2518_v62  ;;  %v941_v62 = vld [vmem:[#allocation2] sm:$0x3f] }
 0x14d   : > { %v652_v63 = vld.sshfl [vmem:[#allocation1] sm:$0xff pattern:$0x73625140]  ;;  %v653_v0 = vld.sshfl [vmem:[#allocation1 + $0x8] sm:$0xff pattern:$0x73625140] }
 0x14e   : > { %v2520_v1 = vld.sshfl [vmem:[#allocation1 + $0x10] sm:$0xff pattern:$0x73625140] }
 0x14f   : > { %692 = vst [vmem:[#allocation1] ss:$4 sm:$0xff] %v684_v4  ;;  %v297_v4 = vsel %vm296_vm10, %v2516_v60, %v2499_v39 }
 0x151   : > { %603 = vrot.lane.b32.xlu2 %v599_v44, %s2265_s25 }
 0x152   : > { %576 = vrot.lane.b32.xlu1 %v572_v35, %s2261_s21  ;;  %s2284_s21 = smov 88  }
 0x153   : > { %v2523_v5 = vpop.permute.xlu2 %348 }
 0x154   : > { %v318_v8 = vpop.permute.xlu1 %317 }
 0x156   : > { %v693_v11 = vld.sshfl [vmem:[#allocation1] sm:$0xff pattern:$0x73625140]  ;;  %v2527_v12 = vld.sshfl [vmem:[#allocation1 + $0x8] sm:$0xff pattern:$0x73625140] }
 0x157   : > { %v695_v13 = vld.sshfl [vmem:[#allocation1 + $0x10] sm:$0xff pattern:$0x73625140]  ;;  %696 = vrot.lane.b32.xlu0 %v693_v11, %s2267_s29 }
 0x158   : > { %719 = vst [vmem:[#allocation1] ss:$4 sm:$0xff] %v711_v14 }
 0x159   : > { %632 = vrot.lane.b32.xlu2 %v627_v57, %s2264_s24  ;;  %v792_v57 = vld [vmem:[#allocation2] sm:$0x3f] }
 0x15a   : > { %601 = vrot.lane.b32.xlu1 %v598_v43, %s2265_s25  ;;  %v765_v43 = vld [vmem:[#allocation2] sm:$0x3f] }
 0x15b   : > { %v2531_v15 = vpop.permute.xlu2 %373 }
 0x15c   : > { %v2533_v21 = vpop.permute.xlu1 %321 }
 0x15d   : > { %v345_v38 = vpop.permute.xlu0 %344 }
 0x15f   : > { %v2537_v23 = vld.sshfl [vmem:[#allocation1] sm:$0xff pattern:$0x73625140]  ;;  %v721_v24 = vld.sshfl [vmem:[#allocation1 + $0x8] sm:$0xff pattern:$0x73625140]  ;;  %1052 = vperm.xlu0 %2060, %v1049_v20  }
 0x160   : > { %v2539_v26 = vld.sshfl [vmem:[#allocation1 + $0x10] sm:$0xff pattern:$0x73625140] }
 0x161   : > { %746 = vst [vmem:[#allocation1] ss:$4 sm:$0xff] %v738_v27  ;;  %657 = vrot.lane.b32.xlu2 %v653_v0, %s2268_s3 }
 0x162   : > { %605 = vrot.lane.b32.xlu1 %v600_v46, %s2265_s25  ;;  %s2289_s25 = smov 24  }
 0x163   : > { %v2542_v29 = vpop.permute.xlu2 %402 }
 0x164   : > { %v2544_v30 = vpop.permute.xlu1 %346 }
 0x165   : > { %v2557_v55 = vpop.permute.xlu0 %891  ;;  %v351_v6 = vsel %vm350_vm9, %v345_v38, %v2544_v30 }
 0x166   : > { %3252 = vst [vmem:[#allocation20_spill] sm:$0xff] %v2557_v55  ;;  %v995_v55 = vld [vmem:[#allocation2] sm:$0x3f] }
 0x167   : > { %2062 = vset.pattern.permute.xlu0 %v2269_v34  ;;  %v819_v34 = vld [vmem:[#allocation2] sm:$0x3f] }
 0x168   : > { %v747_v35 = vld.sshfl [vmem:[#allocation1] sm:$0xff pattern:$0x73625140]  ;;  %v2546_v36 = vld.sshfl [vmem:[#allocation1 + $0x8] sm:$0xff pattern:$0x73625140] }
 0x169   : > { %v749_v41 = vld.sshfl [vmem:[#allocation1 + $0x10] sm:$0xff pattern:$0x73625140]  ;;  %750 = vrot.lane.b32.xlu0 %v747_v35, %s2270_s4  ;;  %1093 = vperm.xlu2 %2061, %v1090_v33  }
 0x16a   : > { %773 = vst [vmem:[#allocation1] ss:$4 sm:$0xff] %v765_v43  ;;  %630 = vrot.lane.b32.xlu1 %v626_v56, %s2264_s24  ;;  %v324_v56 = vsel %vm323_vm8, %v318_v8, %v2510_v52  ;;  %v301_v8 = vmul.f32 %v297_v4, %v2508_v51  ;;  %v1117_v4 = vld [vmem:[#allocation3] sm:$0x3]  ;;  %s2288_s24 = smov 87  }
 0x16b   : > { %v2550_v44 = vpop.permute.xlu2 %427  ;;  %v328_v11 = vmul.f32 %v324_v56, %v2456_v9 }
 0x16c   : > { %3251 = vst [vmem:[#allocation19_spill] sm:$0xff] %v2550_v44  ;;  %v372_v46 = vpop.permute.xlu1 %371 }
 0x16d   : > { %v330_v14 = vadd.f32 %v328_v11, %v301_v8  ;;  %v846_v8 = vld [vmem:[#allocation2] sm:$0x3f] }
 0x171   : > { %v2552_v48 = vld.sshfl [vmem:[#allocation1] sm:$0xff pattern:$0x73625140]  ;;  %v775_v49 = vld.sshfl [vmem:[#allocation1 + $0x8] sm:$0xff pattern:$0x73625140]  ;;  %700 = vrot.lane.b32.xlu2 %v695_v13, %s2267_s29  ;;  %v355_v13 = vmul.f32 %v351_v6, %v2470_v31 }
 0x172   : > { %v2555_v53 = vld.sshfl [vmem:[#allocation1 + $0x10] sm:$0xff pattern:$0x73625140]  ;;  %655 = vrot.lane.b32.xlu1 %v652_v63, %s2268_s3  ;;  %v378_v63 = vsel %vm377_vm11, %v372_v46, %v2531_v15 }
 0x173   : > { %800 = vst [vmem:[#allocation1] ss:$4 sm:$0xff] %v792_v57  ;;  %v2562_v58 = vpop.permute.xlu2 %972  ;;  %v382_v60 = vmul.f32 %v378_v63, %v2458_v16  ;;  %v357_v38 = vadd.f32 %v355_v13, %v330_v14 }
 0x174   : > { %3253 = vst [vmem:[#allocation21_spill] sm:$0xff] %v2562_v58  ;;  %v2564_v0 = vpop.permute.xlu1 %375 }
 0x175   : > { %v384_v57 = vadd.f32 %v382_v60, %v357_v38 }
 0x179   : > { %725 = vrot.lane.b32.xlu2 %v721_v24, %s2271_s20  ;;  %v399_v24 = vpop.permute.xlu0 %398 }
 0x17a   : > { %v801_v20 = vld.sshfl [vmem:[#allocation1] sm:$0xff pattern:$0x73625140]  ;;  %v2577_v27 = vld.sshfl [vmem:[#allocation1 + $0x8] sm:$0xff pattern:$0x73625140]  ;;  %659 = vrot.lane.b32.xlu1 %v2520_v1, %s2268_s3 }
 0x17b   : > { %v803_v33 = vld.sshfl [vmem:[#allocation1 + $0x10] sm:$0xff pattern:$0x73625140]  ;;  %804 = vrot.lane.b32.xlu0 %v801_v20, %s2272_s5  ;;  %v2583_v35 = vpop.permute.xlu2 %456  ;;  %v2273_v20 = vmov 18   ;;  %s2293_s3 = smov 103  }
 0x17c   : > { %3254 = vst [vmem:[#allocation22_spill] sm:$0xff] %v2583_v35  ;;  %v2585_v43 = vpop.permute.xlu1 %400  ;;  %2063 = vset.pattern.permute.xlu2 %v2273_v20 }
 0x17d   : > { %827 = vst [vmem:[#allocation1] ss:$4 sm:$0xff] %v819_v34  ;;  %v405_v46 = vsel %vm404_vm12, %v399_v24, %v2585_v43  ;;  %v887_v24 = vld [vmem:[#allocation2] sm:$0x3f] }
 0x17e   : > { %3255 = vst [vmem:[#allocation23_spill] sm:$0xff] %v2585_v43  ;;  %v409_v56 = vmul.f32 %v405_v46, %v2472_v37  ;;  %v1225_v43 = vld [vmem:[#allocation3] sm:$0x3] }
 0x180   : > { %v411_v1 = vadd.f32 %v409_v56, %v384_v57 }
 0x181   : > { %754 = vrot.lane.b32.xlu2 %v749_v41, %s2270_s4  ;;  %v453_v56 = vpop.permute.xlu0 %452 }
 0x182   : > { %698 = vrot.lane.b32.xlu1 %v2527_v12, %s2267_s29  ;;  %v2275_v12 = vmov 25   ;;  %s2291_s29 = smov 55  }
 0x183   : > { %1120 = vperm.xlu0 %2062, %v1117_v4   ;;  %v2597_v14 = vpop.permute.xlu2 %495 }
 0x184   : > { %v2593_v6 = vld.sshfl [vmem:[#allocation1] sm:$0xff pattern:$0x73625140]  ;;  %v829_v11 = vld.sshfl [vmem:[#allocation1 + $0x8] sm:$0xff pattern:$0x73625140]  ;;  %v426_v13 = vpop.permute.xlu1 %425 }
 0x185   : > { %v2595_v63 = vld.sshfl [vmem:[#allocation1 + $0x10] sm:$0xff pattern:$0x73625140] }
 0x186   : > { %854 = vst [vmem:[#allocation1] ss:$4 sm:$0xff] %v846_v8 }
 0x189   : > { %779 = vrot.lane.b32.xlu2 %v775_v49, %s2274_s6  ;;  %v1144_v49 = vld [vmem:[#allocation3] sm:$0x3] }
 0x18a   : > { %723 = vrot.lane.b32.xlu1 %v2537_v23, %s2271_s20  ;;  %v432_v23 = vsel %vm431_vm13, %v426_v13, %v2550_v44  ;;  %v914_v13 = vld [vmem:[#allocation2] sm:$0x3f] }
 0x18b   : > { %2064 = vset.pattern.permute.xlu0 %v2275_v12  ;;  %v2607_v46 = vpop.permute.xlu2 %524  ;;  %v436_v57 = vmul.f32 %v432_v23, %v2486_v17 }
 0x18c   : > { %v2604_v34 = vpop.permute.xlu1 %429 }
 0x18d   : > { %v855_v41 = vld.sshfl [vmem:[#allocation1] sm:$0xff pattern:$0x73625140]  ;;  %v2602_v60 = vld.sshfl [vmem:[#allocation1 + $0x8] sm:$0xff pattern:$0x73625140] }
 0x18e   : > { %3256 = vst [vmem:[#allocation24_spill] sm:$0xff] %v2604_v34  ;;  %v857_v38 = vld.sshfl [vmem:[#allocation1 + $0x10] sm:$0xff pattern:$0x73625140]  ;;  %858 = vrot.lane.b32.xlu0 %v855_v41, %s2276_s7 }
 0x18f   : > { %895 = vst [vmem:[#allocation1] ss:$4 sm:$0xff] %v887_v24  ;;  %v438_v24 = vadd.f32 %v436_v57, %v411_v1 }
 0x191   : > { %1147 = vperm.xlu2 %2063, %v1144_v49  }
 0x192   : > { %727 = vrot.lane.b32.xlu1 %v2539_v26, %s2271_s20  ;;  %s2297_s20 = smov 102  }
 0x193   : > { %v2625_v26 = vpop.permute.xlu2 %549 }
 0x194   : > { %v2614_v4 = vpop.permute.xlu1 %454 }
 0x195   : > { %3257 = vst [vmem:[#allocation25_spill] sm:$0xff] %v2614_v4  ;;  %v459_v12 = vsel %vm458_vm14, %v453_v56, %v2614_v4 }
 0x196   : > { %v2616_v8 = vld.sshfl [vmem:[#allocation1] sm:$0xff pattern:$0x73625140]  ;;  %v897_v20 = vld.sshfl [vmem:[#allocation1 + $0x8] sm:$0xff pattern:$0x73625140]  ;;  %v463_v49 = vmul.f32 %v459_v12, %v2474_v42 }
 0x197   : > { %v2620_v41 = vld.sshfl [vmem:[#allocation1 + $0x10] sm:$0xff pattern:$0x73625140]  ;;  %v1021_v42 = vld [vmem:[#allocation2] sm:$0x3f] }
 0x198   : > { %922 = vst [vmem:[#allocation1] ss:$4 sm:$0xff] %v914_v13  ;;  %v2623_v23 = vadd.f32 %v463_v49, %v438_v24  ;;  %v2280_v13 = vmov 39  }
 0x199   : > { %808 = vrot.lane.b32.xlu2 %v803_v33, %s2272_s5  ;;  %v1171_v33 = vld [vmem:[#allocation3] sm:$0x3] }
 0x19a   : > { %752 = vrot.lane.b32.xlu1 %v2546_v36, %s2270_s4  ;;  %s2294_s4 = smov 23  }
 0x19b   : > { %v2634_v1 = vpop.permute.xlu2 %1025 }
 0x19c   : > { %v494_v18 = vpop.permute.xlu1 %493  ;;  %3258 = vst [vmem:[#allocation26_spill] sm:$0xff] %v2634_v1 }
 0x19f   : > { %v923_v2 = vld.sshfl [vmem:[#allocation1] sm:$0xff pattern:$0x73625140]  ;;  %v2630_v58 = vld.sshfl [vmem:[#allocation1 + $0x8] sm:$0xff pattern:$0x73625140] }
 0x1a0   : > { %v925_v56 = vld.sshfl [vmem:[#allocation1 + $0x10] sm:$0xff pattern:$0x73625140]  ;;  %926 = vrot.lane.b32.xlu0 %v923_v2, %s2277_s8  ;;  %v968_v2 = vld [vmem:[#allocation2] sm:$0x3f] }
 0x1a1   : > { %949 = vst [vmem:[#allocation1] ss:$4 sm:$0xff] %v941_v62  ;;  %833 = vrot.lane.b32.xlu2 %v829_v11, %s2278_s14  ;;  %v2279_v11 = vmov 32  }
 0x1a2   : > { %777 = vrot.lane.b32.xlu1 %v2552_v48, %s2274_s6  ;;  %2065 = vset.pattern.permute.xlu2 %v2279_v11  ;;  %v1198_v11 = vld [vmem:[#allocation3] sm:$0x3] }
 0x1a3   : > { %v2649_v62 = vpop.permute.xlu2 %578 }
 0x1a4   : > { %v2638_v36 = vpop.permute.xlu1 %497 }
 0x1a8   : > { %v2640_v57 = vld.sshfl [vmem:[#allocation1] sm:$0xff pattern:$0x73625140]  ;;  %v2642_v12 = vld.sshfl [vmem:[#allocation1 + $0x8] sm:$0xff pattern:$0x73625140]  ;;  %1174 = vperm.xlu0 %2064, %v1171_v33  }
 0x1a9   : > { %v2644_v24 = vld.sshfl [vmem:[#allocation1 + $0x10] sm:$0xff pattern:$0x73625140]  ;;  %862 = vrot.lane.b32.xlu2 %v857_v38, %s2276_s7 }
 0x1aa   : > { %976 = vst [vmem:[#allocation1] ss:$4 sm:$0xff] %v968_v2  ;;  %781 = vrot.lane.b32.xlu1 %v2555_v53, %s2274_s6  ;;  %v2657_v53 = vpop.permute.xlu0 %945  ;;  %s2299_s6 = smov 70  }
 0x1ab   : > { %3259 = vst [vmem:[#allocation27_spill] sm:$0xff] %v2657_v53  ;;  %v2661_v2 = vpop.permute.xlu2 %603  ;;  %v500_v53 = vsel %vm499_vm1, %v494_v18, %v2597_v14 }
 0x1ac   : > { %v523_v48 = vpop.permute.xlu1 %522  ;;  %v504_v35 = vmul.f32 %v500_v53, %v2491_v25 }
 0x1b0   : > { %2066 = vset.pattern.permute.xlu0 %v2280_v13 }
 0x1b1   : > { %v977_v49 = vld.sshfl [vmem:[#allocation1] sm:$0xff pattern:$0x73625140]  ;;  %v2651_v1 = vld.sshfl [vmem:[#allocation1 + $0x8] sm:$0xff pattern:$0x73625140]  ;;  %901 = vrot.lane.b32.xlu2 %v897_v20, %s2282_s18 }
 0x1b2   : > { %v2653_v33 = vld.sshfl [vmem:[#allocation1 + $0x10] sm:$0xff pattern:$0x73625140]  ;;  %980 = vrot.lane.b32.xlu0 %v977_v49, %s2281_s17  ;;  %806 = vrot.lane.b32.xlu1 %v2577_v27, %s2272_s5  ;;  %s2298_s5 = smov 39  }
 0x1b3   : > { %1003 = vst [vmem:[#allocation1] ss:$4 sm:$0xff] %v995_v55  ;;  %v521_v55 = vpop.permute.xlu0 %520  ;;  %v2677_v4 = vpop.permute.xlu2 %632 }
 0x1b4   : > { %v548_v38 = vpop.permute.xlu1 %547  ;;  %v527_v20 = vsel %vm526_vm15, %v521_v55, %v523_v48 }
 0x1b5   : > { %v531_v17 = vmul.f32 %v527_v20, %v2476_v47 }
 0x1b9   : > { %1201 = vperm.xlu2 %2065, %v1198_v11   ;;  %v554_v11 = vsel %vm553_vm2, %v548_v38, %v2625_v26  ;;  %v1048_v38 = vld [vmem:[#allocation2] sm:$0x3f] }
 0x1ba   : > { %v2663_v13 = vld.sshfl [vmem:[#allocation1] sm:$0xff pattern:$0x73625140]  ;;  %v2665_v28 = vld.sshfl [vmem:[#allocation1 + $0x8] sm:$0xff pattern:$0x73625140]  ;;  %831 = vrot.lane.b32.xlu1 %v2593_v6, %s2278_s14  ;;  %v558_v55 = vmul.f32 %v554_v11, %v2495_v32 }
 0x1bb   : > { %v2667_v49 = vld.sshfl [vmem:[#allocation1 + $0x10] sm:$0xff pattern:$0x73625140]  ;;  %v575_v37 = vpop.permute.xlu0 %574 }
 0x1bc   : > { %1029 = vst [vmem:[#allocation1] ss:$4 sm:$0xff] %v1021_v42  ;;  %v552_v27 = vpop.permute.xlu1 %551 }
 0x1c1   : > { %930 = vrot.lane.b32.xlu2 %v925_v56, %s2277_s8  ;;  %v533_v56 = vadd.f32 %v531_v17, %v504_v35  ;;  %v528_v17 = vsel %vm526_vm15, %v523_v48, %v2607_v46 }
 0x1c2   : > { %835 = vrot.lane.b32.xlu1 %v2595_v63, %s2278_s14  ;;  %v2693_v63 = vpop.permute.xlu2 %657  ;;  %v532_v48 = vmul.f32 %v528_v17, %v2476_v47  ;;  %s2305_s14 = smov 117  }
 0x1c3   : > { %v2680_v42 = vld.sshfl [vmem:[#allocation1 + $0x8] sm:$0xff pattern:$0x73625140]  ;;  %v2682_v6 = vld.sshfl [vmem:[#allocation1 + $0x10] sm:$0xff pattern:$0x73625140]  ;;  %v560_v34 = vadd.f32 %v558_v55, %v533_v56 }
 0x1c4   : > { %v1030_v18 = vld.sshfl [vmem:[#allocation1] sm:$0xff pattern:$0x73625140]  ;;  %v577_v20 = vpop.permute.xlu1 %576 }
 0x1c5   : > { %1033 = vrot.lane.b32.xlu0 %v1030_v18, %s2283_s19  ;;  %1056 = vst [vmem:[#allocation1] ss:$4 sm:$0xff] %v1048_v38  ;;  %v581_v44 = vsel %vm580_vm3, %v575_v37, %v577_v20 }
 0x1c6   : > { %v585_v16 = vmul.f32 %v581_v44, %v2478_v54  ;;  %v1089_v44 = vld [vmem:[#allocation2] sm:$0x3f] }
 0x1c8   : > { %v587_v53 = vadd.f32 %v585_v16, %v560_v34 }
 0x1c9   : > { %955 = vrot.lane.b32.xlu2 %v2642_v12, %s2284_s21  ;;  %v501_v12 = vsel %vm499_vm1, %v2597_v14, %v2638_v36  ;;  %v2720_v14 = vpop.permute.xlu0 %999 }
 0x1ca   : > { %860 = vrot.lane.b32.xlu1 %v2602_v60, %s2276_s7  ;;  %v555_v60 = vsel %vm553_vm2, %v2625_v26, %v552_v27  ;;  %v505_v55 = vmul.f32 %v501_v12, %v2491_v25  ;;  %v2727_v56 = vpop.permute.xlu2 %1093  ;;  %v2285_v25 = vmov 5   ;;  %v1143_v12 = vld [vmem:[#allocation2] sm:$0x3f]  ;;  %vm702_vm2 = vcmask 990208   ;;  %s2302_s7 = smov 38  }
 0x1cb   : > { %v559_v18 = vmul.f32 %v555_v60, %v2495_v32 }
 0x1cc   : > { %v2699_v35 = vld.sshfl [vmem:[#allocation1] sm:$0xff pattern:$0x73625140]  ;;  %v2701_v37 = vld.sshfl [vmem:[#allocation1 + $0x8] sm:$0xff pattern:$0x73625140]  ;;  %v602_v34 = vpop.permute.xlu1 %601  ;;  %v534_v26 = vadd.f32 %v532_v48, %v505_v55 }
 0x1cd   : > { %1228 = vperm.xlu0 %2066, %v1225_v43   ;;  %v2703_v16 = vld.sshfl [vmem:[#allocation1 + $0x10] sm:$0xff pattern:$0x73625140]  ;;  %v608_v46 = vsel %vm607_vm4, %v602_v34, %v2661_v2  ;;  %v582_v43 = vsel %vm580_vm3, %v577_v20, %v2649_v62  ;;  %v1252_v55 = vld [vmem:[#allocation3] sm:$0x3]  ;;  %vm729_vm3 = vcmask 859136  }
 0x1ce   : > { %1097 = vst [vmem:[#allocation1] ss:$4 sm:$0xff] %v1089_v44  ;;  %v612_v11 = vmul.f32 %v608_v46, %v2501_v40  ;;  %v586_v36 = vmul.f32 %v582_v43, %v2478_v54  ;;  %v561_v62 = vadd.f32 %v559_v18, %v534_v26  ;;  %v2287_v44 = vmov 46  }
 0x1cf   : > { %2067 = vset.pattern.permute.xlu2 %v2287_v44 }
 0x1d0   : > { %v614_v38 = vadd.f32 %v612_v11, %v587_v53 }
 0x1d1   : > { %984 = vrot.lane.b32.xlu2 %v2653_v33, %s2281_s17  ;;  %v1116_v33 = vld [vmem:[#allocation2] sm:$0x3f]  ;;  %v629_v34 = vpop.permute.xlu0 %628 }
 0x1d2   : > { %899 = vrot.lane.b32.xlu1 %v2616_v8, %s2282_s18  ;;  %v588_v8 = vadd.f32 %v586_v36, %v561_v62  ;;  %v2746_v43 = vpop.permute.xlu2 %700  ;;  %v3260_v36 = vlaneseq }
 0x1d4   : > { %v606_v32 = vpop.permute.xlu1 %605 }
 0x1d5   : > { %v1098_v47 = vld.sshfl [vmem:[#allocation1] sm:$0xff pattern:$0x73625140]  ;;  %v2725_v27 = vld.sshfl [vmem:[#allocation1 + $0x8] sm:$0xff pattern:$0x73625140]  ;;  %2068 = vset.pattern.permute.xlu0 %v2285_v25  ;;  %v609_v54 = vsel %vm607_vm4, %v2661_v2, %v606_v32 }
 0x1d6   : > { %v2729_v20 = vld.sshfl [vmem:[#allocation1 + $0x10] sm:$0xff pattern:$0x73625140]  ;;  %1101 = vrot.lane.b32.xlu0 %v1098_v47, %s2286_s22  ;;  %v613_v53 = vmul.f32 %v609_v54, %v2501_v40  ;;  %v2751_v47 = vand.u32 127, %v3260_v36  ;;  %v1170_v25 = vld [vmem:[#allocation2] sm:$0x3f] }
 0x1d7   : > { %1124 = vst [vmem:[#allocation1] ss:$4 sm:$0xff] %v1116_v33  ;;  %vm756_vm4 = vcmask 728064  }
 0x1d8   : > { %v615_v17 = vadd.f32 %v613_v53, %v588_v8 }
 0x1d9   : > { %1009 = vrot.lane.b32.xlu2 %v2665_v28, %s2229_s15 }
 0x1da   : > { %903 = vrot.lane.b32.xlu1 %v2620_v41, %s2282_s18  ;;  %s2307_s18 = smov 101  }
 0x1dc   : > { %v631_v60 = vpop.permute.xlu1 %630 }
 0x1dd   : > { %v635_v48 = vsel %vm634_vm5, %v629_v34, %v631_v60  ;;  %v636_v40 = vsel %vm634_vm5, %v631_v60, %v2677_v4  ;;  %v2756_v4 = vand.u32 15, %v2751_v47  ;;  %v1293_v34 = vld [vmem:[#allocation3] sm:$0x3]  ;;  %vm783_vm5 = vcmask 596992  }
 0x1de   : > { %v2739_v46 = vld.sshfl [vmem:[#allocation1] sm:$0xff pattern:$0x73625140]  ;;  %v2741_v2 = vld.sshfl [vmem:[#allocation1 + $0x8] sm:$0xff pattern:$0x73625140]  ;;  %v639_v28 = vmul.f32 %v635_v48, %v2480_v61  ;;  %v640_v41 = vmul.f32 %v636_v40, %v2480_v61 }
 0x1df   : > { %v2744_v11 = vld.sshfl [vmem:[#allocation1 + $0x10] sm:$0xff pattern:$0x73625140]  ;;  %vm467_vm15 = vcmp.ge.s32.totalorder %v2756_v4, 3  ;;  %vm670_vm1 = vcmp.ge.s32.totalorder %v2756_v4, 2 }
 0x1e0   : > { %1151 = vst [vmem:[#allocation1] ss:$4 sm:$0xff] %v1143_v12  ;;  %v641_v18 = vadd.f32 %v639_v28, %v614_v38  ;;  %v642_v26 = vadd.f32 %v640_v41, %v615_v17  ;;  %v477_v53 = vsel %vm467_vm15, %v2623_v23, 0.0  ;;  %v1197_v23 = vld [vmem:[#allocation2] sm:$0x3f]  ;;  %vm837_vm15 = vcmask 334848  }
 0x1e1   : > { %1255 = vperm.xlu2 %2067, %v1252_v55  }
 0x1e2   : > { %928 = vrot.lane.b32.xlu1 %v2630_v58, %s2277_s8  ;;  %v726_v58 = vpop.permute.xlu2 %725  ;;  %s2303_s8 = smov 118  }
 0x1e4   : > { %v656_v62 = vpop.permute.xlu1 %655 }
 0x1e5   : > { %v662_v61 = vsel %vm661_vm7, %v656_v62, %v2693_v63  ;;  %v1224_v62 = vld [vmem:[#allocation2] sm:$0x3f] }
 0x1e6   : > { %v666_v38 = vmul.f32 %v662_v61, %v2506_v50 }
 0x1e7   : > { %v1152_v32 = vld.sshfl [vmem:[#allocation1] sm:$0xff pattern:$0x73625140]  ;;  %v2760_v33 = vld.sshfl [vmem:[#allocation1 + $0x8] sm:$0xff pattern:$0x73625140] }
 0x1e8   : > { %v2764_v54 = vld.sshfl [vmem:[#allocation1 + $0x10] sm:$0xff pattern:$0x73625140]  ;;  %1155 = vrot.lane.b32.xlu0 %v1152_v32, %s2288_s24  ;;  %v668_v8 = vadd.f32 %v666_v38, %v641_v18  ;;  %v2292_v32 = vmov 12  }
 0x1e9   : > { %1178 = vst [vmem:[#allocation1] ss:$4 sm:$0xff] %v1170_v25  ;;  %1037 = vrot.lane.b32.xlu2 %v2682_v6, %s2283_s19 }
 0x1ea   : > { %v680_v17 = vsel %vm670_vm1, %v668_v8, 0.0  ;;  %953 = vrot.lane.b32.xlu1 %v2640_v57, %s2284_s21  ;;  %v755_v57 = vpop.permute.xlu2 %754  ;;  %2069 = vset.pattern.permute.xlu2 %v2292_v32  ;;  %vm959_vm1 = vcmask 719872  }
 0x1eb   : > { %v2773_v44 = vadd.f32 %v680_v17, %v477_v53  ;;  %v1251_v17 = vld [vmem:[#allocation2] sm:$0x3f] }
 0x1ec   : > { %v660_v12 = vpop.permute.xlu1 %659 }
 0x1ed   : > { %v663_v60 = vsel %vm661_vm7, %v2693_v63, %v660_v12  ;;  %v2290_v63 = vmov 19   ;;  %vm810_vm7 = vcmask 465920  }
 0x1ee   : > { %v667_v48 = vmul.f32 %v663_v60, %v2506_v50 }
 0x1f0   : > { %1296 = vperm.xlu0 %2068, %v1293_v34   ;;  %v2778_v40 = vld.sshfl [vmem:[#allocation1] sm:$0xff pattern:$0x73625140]  ;;  %v2780_v28 = vld.sshfl [vmem:[#allocation1 + $0x8] sm:$0xff pattern:$0x73625140]  ;;  %v2784_v41 = vadd.f32 %v667_v48, %v642_v26 }
 0x1f1   : > { %v2782_v6 = vld.sshfl [vmem:[#allocation1 + $0x10] sm:$0xff pattern:$0x73625140]  ;;  %1062 = vrot.lane.b32.xlu2 %v2701_v37, %s2289_s25 }
 0x1f2   : > { %1205 = vst [vmem:[#allocation1] ss:$4 sm:$0xff] %v1197_v23  ;;  %957 = vrot.lane.b32.xlu1 %v2644_v24, %s2284_s21  ;;  %v697_v24 = vpop.permute.xlu0 %696  ;;  %v2799_v37 = vpop.permute.xlu2 %779  ;;  %s2310_s21 = smov 69  }
 0x1f4   : > { %v699_v50 = vpop.permute.xlu1 %698 }
 0x1f5   : > { %v703_v26 = vsel %vm702_vm2, %v697_v24, %v699_v50  ;;  %v704_v60 = vsel %vm702_vm2, %v699_v50, %v2746_v43  ;;  %v1292_v43 = vld [vmem:[#allocation2] sm:$0x3f]  ;;  %v1347_v50 = vld [vmem:[#allocation3] sm:$0x3]  ;;  %vm986_vm2 = vcmask 588800  }
 0x1f6   : > { %v707_v38 = vmul.f32 %v703_v26, %v2482_v3 }
 0x1f8   : > { %2070 = vset.pattern.permute.xlu0 %v2290_v63  ;;  %v1320_v63 = vld [vmem:[#allocation3] sm:$0x3] }
 0x1f9   : > { %v1206_v55 = vld.sshfl [vmem:[#allocation1] sm:$0xff pattern:$0x73625140]  ;;  %v2790_v18 = vld.sshfl [vmem:[#allocation1 + $0x8] sm:$0xff pattern:$0x73625140]  ;;  %1105 = vrot.lane.b32.xlu2 %v2729_v20, %s2286_s22 }
 0x1fa   : > { %v2792_v36 = vld.sshfl [vmem:[#allocation1 + $0x10] sm:$0xff pattern:$0x73625140]  ;;  %1209 = vrot.lane.b32.xlu0 %v1206_v55, %s2291_s29  ;;  %982 = vrot.lane.b32.xlu1 %v2651_v1, %s2281_s17  ;;  %v2815_v12 = vpop.permute.xlu0 %1052  ;;  %v2819_v48 = vpop.permute.xlu2 %1147  ;;  %s2306_s17 = smov 86  }
 0x1fb   : > { %1232 = vst [vmem:[#allocation1] ss:$4 sm:$0xff] %v1224_v62 }
 0x1fc   : > { %v724_v25 = vpop.permute.xlu1 %723 }
 0x1fd   : > { %v730_v61 = vsel %vm729_vm3, %v724_v25, %v726_v58 }
 0x1fe   : > { %v734_v20 = vmul.f32 %v730_v61, %v2514_v59 }
 0x200   : > { %v736_v34 = vadd.f32 %v734_v20, %v707_v38 }
 0x201   : > { %1130 = vrot.lane.b32.xlu2 %v2741_v2, %s2293_s3  ;;  %v708_v2 = vmul.f32 %v704_v60, %v2482_v3 }
 0x202   : > { %v2805_v8 = vld.sshfl [vmem:[#allocation1] sm:$0xff pattern:$0x73625140]  ;;  %v2807_v53 = vld.sshfl [vmem:[#allocation1 + $0x8] sm:$0xff pattern:$0x73625140]  ;;  %1007 = vrot.lane.b32.xlu1 %v2663_v13, %s2229_s15  ;;  %v809_v3 = vpop.permute.xlu2 %808 }
 0x203   : > { %v2811_v1 = vld.sshfl [vmem:[#allocation1 + $0x10] sm:$0xff pattern:$0x73625140] }
 0x204   : > { %1259 = vst [vmem:[#allocation1] ss:$4 sm:$0xff] %v1251_v17  ;;  %v728_v23 = vpop.permute.xlu1 %727 }
 0x205   : > { %v731_v55 = vsel %vm729_vm3, %v726_v58, %v728_v23  ;;  %v751_v58 = vpop.permute.xlu0 %750  ;;  %v1319_v23 = vld [vmem:[#allocation2] sm:$0x3f]  ;;  %vm1039_vm3 = vcmask 326656  }
 0x206   : > { %v735_v62 = vmul.f32 %v731_v55, %v2514_v59 }
 0x208   : > { %v737_v13 = vadd.f32 %v735_v62, %v708_v2  ;;  %v2296_v2 = vmov 33  }
 0x209   : > { %1323 = vperm.xlu2 %2069, %v1320_v63  }
 0x20a   : > { %1011 = vrot.lane.b32.xlu1 %v2667_v49, %s2229_s15  ;;  %s2295_s15 = smov 71  }
 0x20b   : > { %v1260_v24 = vld.sshfl [vmem:[#allocation1] sm:$0xff pattern:$0x73625140]  ;;  %v2824_v26 = vld.sshfl [vmem:[#allocation1 + $0x8] sm:$0xff pattern:$0x73625140] }
 0x20c   : > { %v2828_v25 = vld.sshfl [vmem:[#allocation1 + $0x10] sm:$0xff pattern:$0x73625140]  ;;  %1263 = vrot.lane.b32.xlu0 %v1260_v24, %s2294_s4  ;;  %v753_v59 = vpop.permute.xlu1 %752 }
 0x20d   : > { %1300 = vst [vmem:[#allocation1] ss:$4 sm:$0xff] %v1292_v43  ;;  %v757_v61 = vsel %vm756_vm4, %v751_v58, %v753_v59  ;;  %v758_v32 = vsel %vm756_vm4, %v753_v59, %v755_v57  ;;  %v1346_v43 = vld [vmem:[#allocation2] sm:$0x3f]  ;;  %vm1107_vm4 = vcmask 973824  }
 0x20e   : > { %v761_v38 = vmul.f32 %v757_v61, %v2484_v10  ;;  %v762_v49 = vmul.f32 %v758_v32, %v2484_v10  ;;  %v2847_v10 = vpop.permute.xlu2 %833 }
 0x210   : > { %v763_v63 = vadd.f32 %v761_v38, %v736_v34  ;;  %v764_v57 = vadd.f32 %v762_v49, %v737_v13  ;;  %v1373_v38 = vld [vmem:[#allocation2] sm:$0x3f] }
 0x211   : > { %1159 = vrot.lane.b32.xlu2 %v2764_v54, %s2288_s24 }
 0x212   : > { %1035 = vrot.lane.b32.xlu1 %v2680_v42, %s2283_s19  ;;  %s2309_s19 = smov 54  }
 0x214   : > { %1350 = vperm.xlu0 %2070, %v1347_v50   ;;  %v2837_v20 = vld.sshfl [vmem:[#allocation1] sm:$0xff pattern:$0x73625140]  ;;  %v2839_v17 = vld.sshfl [vmem:[#allocation1 + $0x8] sm:$0xff pattern:$0x73625140]  ;;  %v778_v54 = vpop.permute.xlu1 %777 }
 0x215   : > { %v2841_v60 = vld.sshfl [vmem:[#allocation1 + $0x10] sm:$0xff pattern:$0x73625140]  ;;  %v784_v55 = vsel %vm783_vm5, %v778_v54, %v2799_v37 }
 0x216   : > { %1327 = vst [vmem:[#allocation1] ss:$4 sm:$0xff] %v1319_v23  ;;  %v788_v42 = vmul.f32 %v784_v55, %v2525_v7  ;;  %v2863_v58 = vpop.permute.xlu2 %862 }
 0x218   : > { %v790_v24 = vadd.f32 %v788_v42, %v763_v63 }
 0x219   : > { %1184 = vrot.lane.b32.xlu2 %v2780_v28, %s2295_s15 }
 0x21a   : > { %1060 = vrot.lane.b32.xlu1 %v2699_v35, %s2289_s25 }
 0x21c   : > { %2072 = vset.pattern.permute.xlu0 %v2296_v2  ;;  %v782_v28 = vpop.permute.xlu1 %781 }
 0x21d   : > { %v1328_v34 = vld.sshfl [vmem:[#allocation1] sm:$0xff pattern:$0x73625140]  ;;  %v2852_v62 = vld.sshfl [vmem:[#allocation1 + $0x8] sm:$0xff pattern:$0x73625140]  ;;  %v785_v35 = vsel %vm783_vm5, %v2799_v37, %v782_v28 }
 0x21e   : > { %v2854_v13 = vld.sshfl [vmem:[#allocation1 + $0x10] sm:$0xff pattern:$0x73625140]  ;;  %1331 = vrot.lane.b32.xlu0 %v1328_v34, %s2297_s20  ;;  %v789_v50 = vmul.f32 %v785_v35, %v2525_v7  ;;  %v2300_v28 = vmov 26   ;;  %v298_v35 = vsel %vm296_vm10, %v2499_v39, %v2504_v45  ;;  %vm1134_vm5 = vcmask 842752  }
 0x21f   : > { %1354 = vst [vmem:[#allocation1] ss:$4 sm:$0xff] %v1346_v43  ;;  %v1401_v43 = vld [vmem:[#allocation3] sm:$0x3]  ;;  %2071 = vset.pattern.permute.xlu2 %v2300_v28  ;;  %v302_v39 = vmul.f32 %v298_v35, %v2508_v51  ;;  %v3263_v51 = vld [vmem:[#allocation24_spill] sm:$0xff] }
 0x220   : > { %v791_v49 = vadd.f32 %v789_v50, %v764_v57  ;;  %v2880_v57 = vpop.permute.xlu2 %901  ;;  %v3268_v28 = vld [vmem:[#allocation16_spill] sm:$0xff] }
 0x221   : > { %1213 = vrot.lane.b32.xlu2 %v2792_v36, %s2291_s29 }
 0x222   : > { %1064 = vrot.lane.b32.xlu1 %v2703_v16, %s2289_s25  ;;  %v805_v16 = vpop.permute.xlu0 %804  ;;  %s2315_s25 = smov 85  }
 0x224   : > { %v807_v36 = vpop.permute.xlu1 %806 }
 0x225   : > { %v811_v7 = vsel %vm810_vm7, %v805_v16, %v807_v36  ;;  %v812_v37 = vsel %vm810_vm7, %v807_v36, %v809_v3  ;;  %v1374_v3 = vld [vmem:[#allocation3] sm:$0x3]  ;;  %v1427_v36 = vld [vmem:[#allocation2] sm:$0x3f]  ;;  %vm1161_vm7 = vcmask 711680  }
 0x226   : > { %v2866_v59 = vld.sshfl [vmem:[#allocation1] sm:$0xff pattern:$0x73625140]  ;;  %v2868_v61 = vld.sshfl [vmem:[#allocation1 + $0x8] sm:$0xff pattern:$0x73625140]  ;;  %v815_v23 = vmul.f32 %v811_v7, %v2488_v19  ;;  %v816_v63 = vmul.f32 %v812_v37, %v2488_v19  ;;  %v325_v19 = vsel %vm323_vm8, %v2510_v52, %v2533_v21  ;;  %v379_v21 = vsel %vm377_vm11, %v2531_v15, %v2564_v0 }
 0x227   : > { %v2870_v32 = vld.sshfl [vmem:[#allocation1 + $0x10] sm:$0xff pattern:$0x73625140]  ;;  %v329_v52 = vmul.f32 %v325_v19, %v2456_v9  ;;  %v3261_v9 = vld [vmem:[#allocation23_spill] sm:$0xff]  ;;  %v3262_v0 = vld [vmem:[#allocation13_spill] sm:$0xff]  ;;  %vm873_vm11 = vcmp.ge.s32.totalorder %v2756_v4, 1 }
 0x228   : > { %1381 = vst [vmem:[#allocation1] ss:$4 sm:$0xff] %v1373_v38  ;;  %v817_v42 = vadd.f32 %v815_v23, %v790_v24  ;;  %v818_v2 = vadd.f32 %v816_v63, %v791_v49  ;;  %v406_v7 = vsel %vm404_vm12, %v3261_v9, %v2542_v29  ;;  %v383_v37 = vmul.f32 %v379_v21, %v3262_v0  ;;  %v3266_v29 = vld [vmem:[#allocation22_spill] sm:$0xff]  ;;  %v3269_v21 = vld [vmem:[#allocation15_spill] sm:$0xff] }
 0x229   : > { %1238 = vrot.lane.b32.xlu2 %v2807_v53, %s2298_s5  ;;  %v1400_v53 = vld [vmem:[#allocation2] sm:$0x3f]  ;;  %v331_v15 = vadd.f32 %v329_v52, %v302_v39 }
 0x22a   : > { %1103 = vrot.lane.b32.xlu1 %v2725_v27, %s2286_s22  ;;  %v2917_v23 = vpop.permute.xlu0 %1120  ;;  %s2312_s22 = smov 22  }
 0x22c   : > { %v832_v27 = vpop.permute.xlu1 %831 }
 0x22d   : > { %v838_v24 = vsel %vm837_vm15, %v832_v27, %v2847_v10  ;;  %v253_v27 = vadd.s32 128, %v2751_v47 }
 0x22e   : > { %v842_v50 = vmul.f32 %v838_v24, %v2535_v22 }
 0x22f   : > { %v1382_v54 = vld.sshfl [vmem:[#allocation1] sm:$0xff pattern:$0x73625140]  ;;  %v2878_v55 = vld.sshfl [vmem:[#allocation1 + $0x8] sm:$0xff pattern:$0x73625140] }
 0x230   : > { %v2882_v34 = vld.sshfl [vmem:[#allocation1 + $0x10] sm:$0xff pattern:$0x73625140]  ;;  %1385 = vrot.lane.b32.xlu0 %v1382_v54, %s2299_s6  ;;  %v844_v16 = vadd.f32 %v842_v50, %v817_v42  ;;  %v3265_v42 = vld [vmem:[#allocation14_spill] sm:$0xff]  ;;  %v2301_v50 = vmov 47   ;;  %v2938_v9 = vand.u32 15, %v253_v27 }
 0x231   : > { %1408 = vst [vmem:[#allocation1] ss:$4 sm:$0xff] %v1400_v53  ;;  %1377 = vperm.xlu2 %2071, %v1374_v3   ;;  %v410_v53 = vmul.f32 %v406_v7, %v3265_v42  ;;  %v3267_v3 = vld [vmem:[#allocation25_spill] sm:$0xff]  ;;  %v1454_v7 = vld [vmem:[#allocation2] sm:$0x3f] }
 0x232   : > { %1128 = vrot.lane.b32.xlu1 %v2739_v46, %s2293_s3  ;;  %v352_v46 = vsel %vm350_vm9, %v2544_v30, %v2523_v5  ;;  %v2909_v5 = vpop.permute.xlu2 %1201  ;;  %vm671_vm8 = vcmp.ge.s32.totalorder %v2938_v9, 2  ;;  %v859_v0 = vpop.permute.xlu0 %858  ;;  %vm864_vm9 = vcmask 203776   ;;  %vm468_vm10 = vcmp.ge.s32.totalorder %v2938_v9, 3 }
 0x233   : > { %v356_v45 = vmul.f32 %v352_v46, %v2470_v31  ;;  %v3264_v31 = vld [vmem:[#allocation19_spill] sm:$0xff]  ;;  %vm874_vm12 = vcmp.ge.s32.totalorder %v2938_v9, 1 }
 0x234   : > { %v433_v63 = vsel %vm431_vm13, %v3264_v31, %v3263_v51  ;;  %v836_v19 = vpop.permute.xlu1 %835  ;;  %v681_v31 = vsel %vm671_vm8, %v2784_v41, 0.0  ;;  %vm905_vm13 = vcmask 982016   ;;  %vm1215_vm8 = vcmask 449536  }
 0x235   : > { %v358_v54 = vadd.f32 %v356_v45, %v331_v15  ;;  %v839_v24 = vsel %vm837_vm15, %v2847_v10, %v836_v19  ;;  %v437_v35 = vmul.f32 %v433_v63, %v3268_v28  ;;  %v1455_v63 = vld [vmem:[#allocation3] sm:$0x3]  ;;  %v1495_v19 = vld [vmem:[#allocation2] sm:$0x3f]  ;;  %vm1188_vm15 = vcmask 580608  }
 0x236   : > { %v843_v46 = vmul.f32 %v839_v24, %v2535_v22 }
 0x238   : > { %1404 = vperm.xlu0 %2072, %v1401_v43   ;;  %v2903_v38 = vld.sshfl [vmem:[#allocation1] sm:$0xff pattern:$0x73625140]  ;;  %v2905_v49 = vld.sshfl [vmem:[#allocation1 + $0x8] sm:$0xff pattern:$0x73625140]  ;;  %v460_v43 = vsel %vm458_vm14, %v3267_v3, %v3266_v29 }
 0x239   : > { %v2911_v30 = vld.sshfl [vmem:[#allocation1 + $0x10] sm:$0xff pattern:$0x73625140]  ;;  %1267 = vrot.lane.b32.xlu2 %v2828_v25, %s2294_s4  ;;  %v464_v47 = vmul.f32 %v460_v43, %v3269_v21  ;;  %vm932_vm14 = vcmask 850944  }
 0x23a   : > { %1435 = vst [vmem:[#allocation1] ss:$4 sm:$0xff] %v1427_v36  ;;  %1132 = vrot.lane.b32.xlu1 %v2744_v11, %s2293_s3  ;;  %v385_v11 = vadd.f32 %v383_v37, %v358_v54  ;;  %v845_v36 = vadd.f32 %v843_v46, %v818_v2  ;;  %v2943_v22 = vpop.permute.xlu2 %930  ;;  %v3270_v54 = vld [vmem:[#allocation17_spill] sm:$0xff]  ;;  %s2319_s3 = smov 21  }
 0x23c   : > { %v412_v52 = vadd.f32 %v410_v53, %v385_v11  ;;  %v861_v2 = vpop.permute.xlu1 %860 }
 0x23d   : > { %v865_v37 = vsel %vm864_vm9, %v859_v0, %v861_v2  ;;  %v866_v51 = vsel %vm864_vm9, %v861_v2, %v2863_v58  ;;  %v2308_v2 = vmov 40   ;;  %vm1242_vm9 = vcmask 318464  }
 0x23e   : > { %v439_v25 = vadd.f32 %v437_v35, %v412_v52  ;;  %v870_v42 = vmul.f32 %v866_v51, %v3270_v54  ;;  %2073 = vset.pattern.permute.xlu2 %v2308_v2  ;;  %v3271_v51 = vld [vmem:[#allocation20_spill] sm:$0xff] }
 0x240   : > { %2074 = vset.pattern.permute.xlu0 %v2301_v50  ;;  %v466_v15 = vadd.f32 %v464_v47, %v439_v25  ;;  %v872_v29 = vadd.f32 %v870_v42, %v845_v36  ;;  %v2304_v50 = vmov 20   ;;  %v1549_v36 = vld [vmem:[#allocation2] sm:$0x3f]  ;;  %v927_v25 = vpop.permute.xlu0 %926 }
 0x241   : > { %v1436_v39 = vld.sshfl [vmem:[#allocation1] sm:$0xff pattern:$0x73625140]  ;;  %v2936_v45 = vld.sshfl [vmem:[#allocation1 + $0x8] sm:$0xff pattern:$0x73625140]  ;;  %1306 = vrot.lane.b32.xlu2 %v2839_v17, %s2303_s8 }
 0x242   : > { %v2940_v10 = vld.sshfl [vmem:[#allocation1 + $0x10] sm:$0xff pattern:$0x73625140]  ;;  %1439 = vrot.lane.b32.xlu0 %v1436_v39, %s2302_s7  ;;  %1157 = vrot.lane.b32.xlu1 %v2760_v33, %s2288_s24  ;;  %v869_v33 = vmul.f32 %v865_v37, %v3270_v54  ;;  %v478_v53 = vsel %vm468_vm10, %v466_v15, 0.0  ;;  %v884_v24 = vsel %vm874_vm12, %v872_v29, 0.0  ;;  %s2314_s24 = smov 37  }
 0x243   : > { %1462 = vst [vmem:[#allocation1] ss:$4 sm:$0xff] %v1454_v7  ;;  %v683_v58 = vadd.f32 %v681_v31, %v478_v53  ;;  %v1428_v37 = vld [vmem:[#allocation3] sm:$0x3]  ;;  %vm1269_vm10 = vcmask 187392   ;;  %vm1281_vm12 = vcmp.le.s32.totalorder %v2938_v9, 14 }
 0x244   : > { %v871_v27 = vadd.f32 %v869_v33, %v844_v16  ;;  %v2970_v16 = vpop.permute.xlu2 %955  ;;  %v900_v35 = vpop.permute.xlu1 %899 }
 0x245   : > { %v2968_v28 = vadd.f32 %v884_v24, %v683_v58  ;;  %v906_v46 = vsel %vm905_vm13, %v900_v35, %v2880_v57  ;;  %v3273_v35 = vld [vmem:[#allocation27_spill] sm:$0xff] }
 0x246   : > { %v883_v43 = vsel %vm873_vm11, %v871_v27, 0.0  ;;  %v910_v31 = vmul.f32 %v906_v46, %v3271_v51  ;;  %vm1280_vm11 = vcmp.le.s32.totalorder %v2756_v4, 14 }
 0x247   : > { %v2966_v11 = vadd.f32 %v883_v43, %v2773_v44  ;;  %v1576_v43 = vld [vmem:[#allocation2] sm:$0x3f] }
 0x249   : > { %1335 = vrot.lane.b32.xlu2 %v2854_v13, %s2297_s20 }
 0x24a   : > { %1458 = vperm.xlu0 %2074, %v1455_v63   ;;  %v2957_v3 = vld.sshfl [vmem:[#allocation1] sm:$0xff pattern:$0x73625140]  ;;  %v2959_v17 = vld.sshfl [vmem:[#allocation1 + $0x8] sm:$0xff pattern:$0x73625140]  ;;  %1182 = vrot.lane.b32.xlu1 %v2778_v40, %s2295_s15 }
 0x24b   : > { %v2961_v41 = vld.sshfl [vmem:[#allocation1 + $0x10] sm:$0xff pattern:$0x73625140]  ;;  %v1522_v40 = vld [vmem:[#allocation2] sm:$0x3f]  ;;  %v3272_v63 = vld [vmem:[#allocation18_spill] sm:$0xff] }
 0x24c   : > { %1503 = vst [vmem:[#allocation1] ss:$4 sm:$0xff] %v1495_v19  ;;  %v904_v47 = vpop.permute.xlu1 %903  ;;  %v2985_v13 = vpop.permute.xlu2 %984 }
 0x24d   : > { %v907_v39 = vsel %vm905_vm13, %v2880_v57, %v904_v47  ;;  %vm1310_vm13 = vcmask 965632  }
 0x251   : > { %1360 = vrot.lane.b32.xlu2 %v2868_v61, %s2306_s17 }
 0x252   : > { %2077 = vset.pattern.permute.xlu0 %v2304_v50  ;;  %1186 = vrot.lane.b32.xlu1 %v2782_v6, %s2295_s15  ;;  %v1550_v50 = vld [vmem:[#allocation3] sm:$0x3] }
 0x253   : > { %v1505_v52 = vld.sshfl [vmem:[#allocation1 + $0x8] sm:$0xff pattern:$0x73625140]  ;;  %v2975_v21 = vld.sshfl [vmem:[#allocation1] sm:$0xff pattern:$0x73625140] }
 0x254   : > { %1509 = vrot.lane.b32.xlu0 %v1505_v52, %s2305_s14  ;;  %v2980_v44 = vld.sshfl [vmem:[#allocation1 + $0x10] sm:$0xff pattern:$0x73625140]  ;;  %v929_v57 = vpop.permute.xlu1 %928  ;;  %v2997_v42 = vpop.permute.xlu2 %1009 }
 0x255   : > { %1530 = vst [vmem:[#allocation1] ss:$4 sm:$0xff] %v1522_v40  ;;  %v933_v0 = vsel %vm932_vm14, %v927_v25, %v929_v57  ;;  %v934_v61 = vsel %vm932_vm14, %v929_v57, %v2943_v22  ;;  %vm1337_vm14 = vcmask 834560  }
 0x256   : > { %v937_v54 = vmul.f32 %v933_v0, %v3272_v63  ;;  %v938_v33 = vmul.f32 %v934_v61, %v3272_v63  ;;  %v2311_v61 = vmov 34  }
 0x258   : > { %v939_v53 = vadd.f32 %v937_v54, %v910_v31  ;;  %v3274_v31 = vld [vmem:[#allocation21_spill] sm:$0xff]  ;;  %v1630_v54 = vld [vmem:[#allocation2] sm:$0x3f] }
 0x259   : > { %1431 = vperm.xlu2 %2073, %v1428_v37  }
 0x25a   : > { %1211 = vrot.lane.b32.xlu1 %v2790_v18, %s2291_s29  ;;  %v911_v18 = vmul.f32 %v907_v39, %v3271_v51  ;;  %s2317_s29 = smov 53  }
 0x25c   : > { %v1533_v6 = vld.sshfl [vmem:[#allocation1 + $0x10] sm:$0xff pattern:$0x73625140]  ;;  %v1531_v7 = vld.sshfl [vmem:[#allocation1] sm:$0xff pattern:$0x73625140]  ;;  %v940_v19 = vadd.f32 %v938_v33, %v911_v18  ;;  %v954_v29 = vpop.permute.xlu1 %953  ;;  %v3014_v40 = vpop.permute.xlu2 %1255 }
 0x25d   : > { %1538 = vrot.lane.b32.xlu0 %v1533_v6, %s2307_s18  ;;  %v2990_v15 = vld.sshfl [vmem:[#allocation1 + $0x8] sm:$0xff pattern:$0x73625140]  ;;  %v960_v24 = vsel %vm959_vm1, %v954_v29, %v2970_v16 }
 0x25e   : > { %1557 = vst [vmem:[#allocation1] ss:$4 sm:$0xff] %v1549_v36  ;;  %v964_v46 = vmul.f32 %v960_v24, %v3273_v35 }
 0x260   : > { %v966_v52 = vadd.f32 %v964_v46, %v939_v53 }
 0x261   : > { %1389 = vrot.lane.b32.xlu2 %v2882_v34, %s2299_s6  ;;  %v1603_v34 = vld [vmem:[#allocation2] sm:$0x3f] }
 0x262   : > { %1236 = vrot.lane.b32.xlu1 %v2805_v8, %s2298_s5  ;;  %v3012_v8 = vpop.permute.xlu0 %1174 }
 0x264   : > { %v958_v47 = vpop.permute.xlu1 %957  ;;  %v1038_v0 = vpop.permute.xlu2 %1037 }
 0x265   : > { %1534 = vrot.lane.b32.xlu0 %v1531_v7, %s2307_s18  ;;  %v3002_v22 = vld.sshfl [vmem:[#allocation1] sm:$0xff pattern:$0x73625140]  ;;  %v3004_v27 = vld.sshfl [vmem:[#allocation1 + $0x8] sm:$0xff pattern:$0x73625140]  ;;  %v961_v6 = vsel %vm959_vm1, %v2970_v16, %v958_v47 }
 0x266   : > { %v3006_v58 = vld.sshfl [vmem:[#allocation1 + $0x10] sm:$0xff pattern:$0x73625140]  ;;  %v965_v25 = vmul.f32 %v961_v6, %v3273_v35  ;;  %v1496_v47 = vld [vmem:[#allocation3] sm:$0x3]  ;;  %vm1364_vm1 = vcmask 703488  }
 0x267   : > { %1584 = vst [vmem:[#allocation1] ss:$4 sm:$0xff] %v1576_v43 }
 0x268   : > { %v967_v57 = vadd.f32 %v965_v25, %v940_v19  ;;  %v1604_v19 = vld [vmem:[#allocation3] sm:$0x3] }
 0x269   : > { %1414 = vrot.lane.b32.xlu2 %v2905_v49, %s2309_s19 }
 0x26a   : > { %1240 = vrot.lane.b32.xlu1 %v2811_v1, %s2298_s5  ;;  %v981_v1 = vpop.permute.xlu0 %980 }
 0x26c   : > { %v983_v16 = vpop.permute.xlu1 %982  ;;  %v1063_v43 = vpop.permute.xlu2 %1062 }
 0x26d   : > { %1553 = vperm.xlu0 %2077, %v1550_v50   ;;  %v987_v2 = vsel %vm986_vm2, %v981_v1, %v983_v16  ;;  %v988_v37 = vsel %vm986_vm2, %v983_v16, %v2985_v13  ;;  %vm1391_vm2 = vcmask 572416  }
 0x26e   : > { %v1585_v39 = vld.sshfl [vmem:[#allocation1] sm:$0xff pattern:$0x73625140]  ;;  %v3018_v36 = vld.sshfl [vmem:[#allocation1 + $0x8] sm:$0xff pattern:$0x73625140]  ;;  %v991_v18 = vmul.f32 %v987_v2, %v3274_v31  ;;  %v992_v63 = vmul.f32 %v988_v37, %v3274_v31 }
 0x26f   : > { %v3021_v7 = vld.sshfl [vmem:[#allocation1 + $0x10] sm:$0xff pattern:$0x73625140] }
 0x270   : > { %1611 = vst [vmem:[#allocation1] ss:$4 sm:$0xff] %v1603_v34  ;;  %v993_v33 = vadd.f32 %v991_v18, %v966_v52  ;;  %v994_v53 = vadd.f32 %v992_v63, %v967_v57  ;;  %v1657_v52 = vld [vmem:[#allocation2] sm:$0x3f] }
 0x271   : > { %1443 = vrot.lane.b32.xlu2 %v2940_v10, %s2302_s7 }
 0x272   : > { %1265 = vrot.lane.b32.xlu1 %v2824_v26, %s2294_s4  ;;  %v1034_v57 = vpop.permute.xlu0 %1033  ;;  %s1876_s4 = sshll.u32 %s2358_s13, 3  ;;  %s176_s13 = scalar_lea.vmem [#allocation8], %s1866_s30 }
 0x273   : > { %s1770_s5 = scalar_lea.hbm %s3221_s2, %s1876_s4 }
 0x274   : > { %v1008_v13 = vpop.permute.xlu1 %1007  ;;  %v1106_v34 = vpop.permute.xlu2 %1105 }
 0x275   : > { %1588 = vrot.lane.b32.xlu0 %v1585_v39, %s2310_s21  ;;  %v1013_v29 = vsel %vm232_vm6, %v1008_v13, %v2997_v42 }
 0x276   : > { %2079 = vset.pattern.permute.xlu0 %v2311_v61  ;;  %v1017_v24 = vmul.f32 %v1013_v29, %v2720_v14  ;;  %v3275_v61 = vld [vmem:[#allocation26_spill] sm:$0xff] }
 0x277   : > { %v3030_v51 = vld.sshfl [vmem:[#allocation1] sm:$0xff pattern:$0x73625140]  ;;  %v3032_v49 = vld.sshfl [vmem:[#allocation1 + $0x8] sm:$0xff pattern:$0x73625140] }
 0x278   : > { %v3038_v26 = vld.sshfl [vmem:[#allocation1 + $0x10] sm:$0xff pattern:$0x73625140]  ;;  %v1019_v46 = vadd.f32 %v1017_v24, %v993_v33  ;;  %v1577_v24 = vld [vmem:[#allocation3] sm:$0x3] }
 0x279   : > { %1638 = vst [vmem:[#allocation1] ss:$4 sm:$0xff] %v1630_v54  ;;  %1468 = vrot.lane.b32.xlu2 %v2959_v17, %s2312_s22 }
 0x27a   : > { %1304 = vrot.lane.b32.xlu1 %v2837_v20, %s2303_s8  ;;  %v2313_v20 = vmov 6  }
 0x27b   : > { %2075 = vset.pattern.permute.xlu2 %v2313_v20 }
 0x27c   : > { %v1012_v39 = vpop.permute.xlu1 %1011  ;;  %v1131_v31 = vpop.permute.xlu2 %1130 }
 0x27d   : > { %1607 = vperm.xlu0 %2079, %v1604_v19   ;;  %v1014_v17 = vsel %vm232_vm6, %v2997_v42, %v1012_v39  ;;  %vm1066_vm6 = vcmask 195584   ;;  %v3078_v19 = vpop.permute.xlu0 %1228 }
 0x27e   : > { %v1018_v6 = vmul.f32 %v1014_v17, %v2720_v14 }
 0x280   : > { %v1639_v10 = vld.sshfl [vmem:[#allocation1] sm:$0xff pattern:$0x73625140]  ;;  %v3047_v35 = vld.sshfl [vmem:[#allocation1 + $0x8] sm:$0xff pattern:$0x73625140]  ;;  %v1020_v25 = vadd.f32 %v1018_v6, %v994_v53 }
 0x281   : > { %v3049_v50 = vld.sshfl [vmem:[#allocation1 + $0x10] sm:$0xff pattern:$0x73625140]  ;;  %1499 = vperm.xlu2 %2075, %v1496_v47  }
 0x282   : > { %1665 = vst [vmem:[#allocation1] ss:$4 sm:$0xff] %v1657_v52  ;;  %1308 = vrot.lane.b32.xlu1 %v2841_v60, %s2303_s8  ;;  %s1759_s8 = scalar_lea.sflag [#allocation5], %s2434_s28 }
 0x284   : > { %v1036_v1 = vpop.permute.xlu1 %1035 }
 0x285   : > { %1642 = vrot.lane.b32.xlu0 %v1639_v10, %s2314_s24  ;;  %v1040_v60 = vsel %vm1039_vm3, %v1034_v57, %v1036_v1  ;;  %v1041_v16 = vsel %vm1039_vm3, %v1036_v1, %v1038_v0  ;;  %v2316_v10 = vmov 27   ;;  %vm1418_vm3 = vcmask 441344  }
 0x286   : > { %v1044_v2 = vmul.f32 %v1040_v60, %v3275_v61  ;;  %v1045_v37 = vmul.f32 %v1041_v16, %v3275_v61 }
 0x288   : > { %v1046_v42 = vadd.f32 %v1044_v2, %v1019_v46  ;;  %v1047_v14 = vadd.f32 %v1045_v37, %v1020_v25  ;;  %v1631_v2 = vld [vmem:[#allocation3] sm:$0x3]  ;;  %v2318_v37 = vmov 41  }
 0x289   : > { %1536 = vrot.lane.b32.xlu2 %v2990_v15, %s2307_s18  ;;  %v3073_v15 = vpop.permute.xlu2 %1323 }
 0x28a   : > { %1333 = vrot.lane.b32.xlu1 %v2852_v62, %s2297_s20  ;;  %2078 = vset.pattern.permute.xlu2 %v2316_v10 }
 0x28c   : > { %v1061_v18 = vpop.permute.xlu1 %1060 }
 0x28d   : > { %v1067_v62 = vsel %vm1066_vm6, %v1061_v18, %v1063_v43  ;;  %v1668_v18 = vld.sshfl [vmem:[#allocation1 + $0x10] sm:$0xff pattern:$0x73625140] }
 0x28e   : > { %v1071_v63 = vmul.f32 %v1067_v62, %v2815_v12 }
 0x290   : > { %v1073_v0 = vadd.f32 %v1071_v63, %v1046_v42 }
 0x291   : > { %1507 = vrot.lane.b32.xlu2 %v2975_v21, %s2305_s14 }
 0x292   : > { %1358 = vrot.lane.b32.xlu1 %v2866_v59, %s2306_s17  ;;  %v3069_v54 = vadd.f32 %v1073_v0, %v2966_v11  ;;  %v1160_v11 = vpop.permute.xlu2 %1159 }
 0x294   : > { %v1065_v33 = vpop.permute.xlu1 %1064 }
 0x295   : > { %v1068_v53 = vsel %vm1066_vm6, %v1063_v43, %v1065_v33  ;;  %vm1445_vm6 = vcmask 310272  }
 0x296   : > { %v1072_v59 = vmul.f32 %v1068_v53, %v2815_v12  ;;  %v1102_v12 = vpop.permute.xlu0 %1101 }
 0x298   : > { %v1074_v21 = vadd.f32 %v1072_v59, %v1047_v14 }
 0x299   : > { %1565 = vrot.lane.b32.xlu2 %v3006_v58, %s2315_s25 }
 0x29a   : > { %1362 = vrot.lane.b32.xlu1 %v2870_v32, %s2306_s17  ;;  %v3081_v13 = vadd.f32 %v1074_v21, %v2968_v28  ;;  %v1185_v46 = vpop.permute.xlu2 %1184  ;;  %v2320_v21 = vmov 13  }
 0x29b   : > { %2076 = vset.pattern.permute.xlu1 %v2320_v21 }
 0x29c   : > { %v1104_v32 = vpop.permute.xlu1 %1103 }
 0x29d   : > { %v1108_v58 = vsel %vm1107_vm4, %v1102_v12, %v1104_v32 }
 0x29e   : > { %v1112_v43 = vmul.f32 %v1108_v58, %v2727_v56 }
 0x2a1   : > { %1590 = vrot.lane.b32.xlu2 %v3018_v36, %s2310_s21 }
 0x2a2   : > { %1387 = vrot.lane.b32.xlu1 %v2878_v55, %s2299_s6  ;;  %v1214_v6 = vpop.permute.xlu2 %1213  ;;  %s1772_s6 = sshll.u32 %s176_s13, 4  ;;  %s1773_s6 = int_to_ptr.vmem [resolvable:$true] %s1772_s6 }
 0x2a4   : > { %v1129_v29 = vpop.permute.xlu1 %1128 }
 0x2a5   : > { %v1135_v28 = vsel %vm1134_vm5, %v1129_v29, %v1131_v31 }
 0x2a6   : > { %v1139_v55 = vmul.f32 %v1135_v28, %v2917_v23 }
 0x2a8   : > { %v1141_v36 = vadd.f32 %v1139_v55, %v1112_v43 }
 0x2a9   : > { %1580 = vperm.xlu2 %2078, %v1577_v24  }
 0x2aa   : > { %1412 = vrot.lane.b32.xlu1 %v2903_v38, %s2309_s19  ;;  %v1109_v38 = vsel %vm1107_vm4, %v1104_v32, %v1106_v34  ;;  %vm1472_vm4 = vcmask 179200  }
 0x2ab   : > { %v1113_v47 = vmul.f32 %v1109_v38, %v2727_v56 }
 0x2ac   : > { %v1133_v52 = vpop.permute.xlu1 %1132 }
 0x2ad   : > { %v1136_v20 = vsel %vm1134_vm5, %v1131_v31, %v1133_v52  ;;  %vm1483_vm5 = vcmp.le.s32.totalorder %v2756_v4, 13 }
 0x2ae   : > { %v1140_v39 = vmul.f32 %v1136_v20, %v2917_v23 }
 0x2b0   : > { %v1142_v17 = vadd.f32 %v1140_v39, %v1113_v47 }
 0x2b1   : > { %1619 = vrot.lane.b32.xlu2 %v3038_v26, %s2317_s29  ;;  %v1239_v26 = vpop.permute.xlu2 %1238 }
 0x2b2   : > { %1416 = vrot.lane.b32.xlu1 %v2911_v30, %s2309_s19  ;;  %v1156_v30 = vpop.permute.xlu0 %1155  ;;  %2080 = vset.pattern.permute.xlu2 %v2318_v37  ;;  %s2170_s19 = scalar_lea.hbm %s3221_s2, 16 }
 0x2b4   : > { %v1158_v25 = vpop.permute.xlu1 %1157 }
 0x2b5   : > { %v1162_v34 = vsel %vm1161_vm7, %v1156_v30, %v1158_v25  ;;  %v1163_v57 = vsel %vm1161_vm7, %v1158_v25, %v1160_v11  ;;  %vm1484_vm7 = vcmp.le.s32.totalorder %v2938_v9, 13 }
 0x2b6   : > { %v1166_v1 = vmul.f32 %v1162_v34, %v2819_v48  ;;  %v1167_v56 = vmul.f32 %v1163_v57, %v2819_v48  ;;  %v2321_v57 = vmov 48  }
 0x2b7   : > { %2081 = vset.pattern.permute.xlu0 %v2321_v57 }
 0x2b8   : > { %v1168_v60 = vadd.f32 %v1166_v1, %v1141_v36  ;;  %v1169_v23 = vadd.f32 %v1167_v56, %v1142_v17 }
 0x2b9   : > { %1644 = vrot.lane.b32.xlu2 %v3047_v35, %s2314_s24  ;;  %v3114_v31 = vpop.permute.xlu2 %1377 }
 0x2ba   : > { %1441 = vrot.lane.b32.xlu1 %v2936_v45, %s2302_s7  ;;  %v3110_v48 = vpop.permute.xlu0 %1296  ;;  %s1774_s7 = sshll.u32 %s1770_s5, 4  ;;  %s1775_s7 = int_to_ptr.hbm [resolvable:$true] %s1774_s7 }
 0x2bc   : > { %v1183_v16 = vpop.permute.xlu1 %1182 }
 0x2bd   : > { %v1189_v45 = vsel %vm1188_vm15, %v1183_v16, %v1185_v46 }
 0x2be   : > { %v1193_v61 = vmul.f32 %v1189_v45, %v3012_v8 }
 0x2c0   : > { %v1195_v42 = vadd.f32 %v1193_v61, %v1168_v60 }
 0x2c1   : > { %1634 = vperm.xlu2 %2080, %v1631_v2   ;;  %v1268_v32 = vpop.permute.xlu2 %1267 }
 0x2c2   : > { %1466 = vrot.lane.b32.xlu1 %v2957_v3, %s2312_s22  ;;  %v1210_v63 = vpop.permute.xlu0 %1209 }
 0x2c4   : > { %v1187_v35 = vpop.permute.xlu1 %1186 }
 0x2c5   : > { %v1190_v14 = vsel %vm1188_vm15, %v1185_v46, %v1187_v35  ;;  %vm1540_vm15 = vcmask 826368  }
 0x2c6   : > { %v1194_v3 = vmul.f32 %v1190_v14, %v3012_v8  ;;  %v1523_v8 = vld [vmem:[#allocation3] sm:$0x3] }
 0x2c8   : > { %v1196_v62 = vadd.f32 %v1194_v3, %v1169_v23 }
 0x2c9   : > { %1673 = vrot.lane.b32.xlu2 %v1668_v18, %s2319_s3  ;;  %v1307_v43 = vpop.permute.xlu2 %1306 }
 0x2ca   : > { %1470 = vrot.lane.b32.xlu1 %v2961_v41, %s2312_s22  ;;  %v1264_v46 = vpop.permute.xlu0 %1263 }
 0x2cc   : > { %v1212_v0 = vpop.permute.xlu1 %1211 }
 0x2cd   : > { %v1216_v33 = vsel %vm1215_vm8, %v1210_v63, %v1212_v0  ;;  %v1217_v53 = vsel %vm1215_vm8, %v1212_v0, %v1214_v6  ;;  %vm1567_vm8 = vcmask 695296  }
 0x2ce   : > { %v1220_v41 = vmul.f32 %v1216_v33, %v2909_v5  ;;  %v1221_v59 = vmul.f32 %v1217_v53, %v2909_v5 }
 0x2d0   : > { %v1222_v11 = vadd.f32 %v1220_v41, %v1195_v42  ;;  %v1223_v12 = vadd.f32 %v1221_v59, %v1196_v62  ;;  %v1667_v62 = vld.sshfl [vmem:[#allocation1 + $0x8] sm:$0xff pattern:$0x73625140] }
 0x2d1   : > { %v1336_v36 = vpop.permute.xlu2 %1335 }
 0x2d2   : > { %1511 = vrot.lane.b32.xlu1 %v2980_v44, %s2305_s14  ;;  %v1351_v1 = vpop.permute.xlu0 %1350  ;;  %s2164_s14 = sshra.s32 %s1775_s7, 4  ;;  %s2165_s14 = int_to_ptr.hbm [resolvable:$true] %s2164_s14 }
 0x2d3   : > { %s2166_s17 = scalar_lea.hbm %s2165_s14, 8  ;;  %p2171_p9 = scmp.lt.s32.totalorder %s2165_s14, %s3221_s2 }
 0x2d4   : > { %v1237_v58 = vpop.permute.xlu1 %1236  ;;  %p2167_p1 = scmp.ne.s32.totalorder %s2165_s14, %s2166_s17  ;;  %p2172_p10 = scmp.lt.s32.totalorder %s2170_s19, %s2166_s17 }
 0x2d5   : > { %v1243_v29 = vsel %vm1242_vm9, %v1237_v58, %v1239_v26 }
 0x2d6   : > { %v1247_v44 = vmul.f32 %v1243_v29, %v3078_v19  ;;  %p2168_p4 = pnand %p2167_p1, %p2403_p3  ;;  %p2173_p2 = por %p2172_p10, %p2171_p9 }
 0x2d8   : > { %v1249_v28 = vadd.f32 %v1247_v44, %v1222_v11  ;;  %p2169_p8 = pneg %p2168_p4 }
 0x2d9   : > { %v1361_v34 = vpop.permute.xlu2 %1360 }
 0x2da   : > { %1526 = vperm.xlu1 %2076, %v1523_v8   ;;  %p2174_p11 = pnand %p2173_p2, %p2169_p8 }
 0x2dc   : > { %v1241_v55 = vpop.permute.xlu1 %1240 }
 0x2dd   : > { %v1244_v24 = vsel %vm1242_vm9, %v1239_v26, %v1241_v55  ;;  %vm1513_vm9 = vcmask 957440  }
 0x2de   : > { %v1248_v5 = vmul.f32 %v1244_v24, %v3078_v19 }
 0x2e0   : > { %v1250_v10 = vadd.f32 %v1248_v5, %v1223_v12 }
 0x2e1   : > { %v1432_v60 = vpop.permute.xlu2 %1431 }
 0x2e2   : > { %1563 = vrot.lane.b32.xlu1 %v3004_v27, %s2315_s25 }
 0x2e4   : > { %v1266_v38 = vpop.permute.xlu1 %1265 }
 0x2e5   : > { %v1270_v52 = vsel %vm1269_vm10, %v1264_v46, %v1266_v38  ;;  %v1271_v20 = vsel %vm1269_vm10, %v1266_v38, %v1268_v32  ;;  %vm1594_vm10 = vcmask 564224  }
 0x2e6   : > { %v1274_v47 = vmul.f32 %v1270_v52, %v3014_v40  ;;  %v1275_v39 = vmul.f32 %v1271_v20, %v3014_v40  ;;  %v1658_v40 = vld [vmem:[#allocation3] sm:$0x3] }
 0x2e7   : > { %1661 = vperm.xlu0 %2081, %v1658_v40  }
 0x2e8   : > { %v1276_v27 = vadd.f32 %v1274_v47, %v1249_v28  ;;  %v1277_v19 = vadd.f32 %v1275_v39, %v1250_v10 }
 0x2e9   : > { %v1390_v35 = vpop.permute.xlu2 %1389 }
 0x2ea   : > { %1561 = vrot.lane.b32.xlu1 %v3002_v22, %s2315_s25  ;;  %v1288_v17 = vsel %vm1280_vm11, %v1276_v27, 0.0  ;;  %v1289_v6 = vsel %vm1281_vm12, %v1277_v19, 0.0  ;;  %vm1621_vm11 = vcmask 433152   ;;  %vm1648_vm12 = vcmask 302080  }
 0x2eb   : > { %v3135_v22 = vadd.f32 %v1288_v17, %v3069_v54  ;;  %v3138_v30 = vadd.f32 %v1289_v6, %v3081_v13  ;;  %v1332_v13 = vpop.permute.xlu0 %1331 }
 0x2ec   : > { %v1305_v25 = vpop.permute.xlu1 %1304 }
 0x2f1   : > { %v1415_v63 = vpop.permute.xlu2 %1414 }
 0x2f2   : > { %1592 = vrot.lane.b32.xlu1 %v3021_v7, %s2310_s21  ;;  %v1311_v7 = vsel %vm1310_vm13, %v1305_v25, %v1307_v43 }
 0x2f3   : > { %v1315_v45 = vmul.f32 %v1311_v7, %v3110_v48  ;;  %v1386_v41 = vpop.permute.xlu0 %1385 }
 0x2f4   : > { %v1309_v56 = vpop.permute.xlu1 %1308 }
 0x2f5   : > { %v1312_v54 = vsel %vm1310_vm13, %v1307_v43, %v1309_v56  ;;  %vm1675_vm13 = vcmask 171008  }
 0x2f6   : > { %v1316_v61 = vmul.f32 %v1312_v54, %v3110_v48 }
 0x2f9   : > { %v1444_v8 = vpop.permute.xlu2 %1443 }
 0x2fa   : > { %1617 = vrot.lane.b32.xlu1 %v3032_v49, %s2317_s29 }
 0x2fb   : > { %v1405_v44 = vpop.permute.xlu0 %1404 }
 0x2fc   : > { %v1334_v23 = vpop.permute.xlu1 %1333 }
 0x2fd   : > { %v1338_v26 = vsel %vm1337_vm14, %v1332_v13, %v1334_v23  ;;  %v1339_v16 = vsel %vm1337_vm14, %v1334_v23, %v1336_v36  ;;  %vm1687_vm14 = vcmp.le.s32.totalorder %v2938_v9, 12 }
 0x2fe   : > { %v1342_v49 = vmul.f32 %v1338_v26, %v3073_v15  ;;  %v1343_v2 = vmul.f32 %v1339_v16, %v3073_v15  ;;  %v1666_v15 = vld.sshfl [vmem:[#allocation1] sm:$0xff pattern:$0x73625140] }
 0x300   : > { %v1344_v37 = vadd.f32 %v1342_v49, %v1315_v45  ;;  %v1345_v42 = vadd.f32 %v1343_v2, %v1316_v61 }
 0x301   : > { %v1469_v55 = vpop.permute.xlu2 %1468 }
 0x302   : > { %1615 = vrot.lane.b32.xlu1 %v3030_v51, %s2317_s29 }
 0x303   : > { %v1440_v52 = vpop.permute.xlu0 %1439 }
 0x304   : > { %v1359_v51 = vpop.permute.xlu1 %1358 }
 0x305   : > { %v1365_v14 = vsel %vm1364_vm1, %v1359_v51, %v1361_v34 }
 0x306   : > { %v1369_v3 = vmul.f32 %v1365_v14, %v1351_v1 }
 0x308   : > { %v1371_v18 = vadd.f32 %v1369_v3, %v1344_v37 }
 0x309   : > { %v3154_v38 = vpop.permute.xlu2 %1499 }
 0x30a   : > { %1646 = vrot.lane.b32.xlu1 %v3049_v50, %s2314_s24 }
 0x30c   : > { %v1363_v48 = vpop.permute.xlu1 %1362 }
 0x30d   : > { %v1366_v0 = vsel %vm1364_vm1, %v1361_v34, %v1363_v48  ;;  %v1459_v34 = vpop.permute.xlu0 %1458  ;;  %vm1698_vm1 = vcmask 1041408  }
 0x30e   : > { %v1370_v33 = vmul.f32 %v1366_v0, %v1351_v1 }
 0x310   : > { %v1372_v53 = vadd.f32 %v1370_v33, %v1345_v42 }
 0x311   : > { %v1537_v6 = vpop.permute.xlu2 %1536 }
 0x312   : > { %1671 = vrot.lane.b32.xlu1 %v1667_v62, %s2319_s3 }
 0x314   : > { %v1388_v59 = vpop.permute.xlu1 %1387 }
 0x315   : > { %v1392_v21 = vsel %vm1391_vm2, %v1386_v41, %v1388_v59  ;;  %v1393_v50 = vsel %vm1391_vm2, %v1388_v59, %v1390_v35  ;;  %vm1686_vm2 = vcmp.le.s32.totalorder %v2756_v4, 12 }
 0x316   : > { %v1396_v32 = vmul.f32 %v1392_v21, %v3114_v31  ;;  %v1397_v11 = vmul.f32 %v1393_v50, %v3114_v31 }
 0x318   : > { %v1398_v12 = vadd.f32 %v1396_v32, %v1371_v18  ;;  %v1399_v58 = vadd.f32 %v1397_v11, %v1372_v53 }
 0x319   : > { %v1508_v23 = vpop.permute.xlu2 %1507 }
 0x31a   : > { %1669 = vrot.lane.b32.xlu1 %v1666_v15, %s2319_s3 }
 0x31c   : > { %v1413_v29 = vpop.permute.xlu1 %1412 }
 0x31d   : > { %v1419_v28 = vsel %vm1418_vm3, %v1413_v29, %v1415_v63 }
 0x31e   : > { %v1423_v43 = vmul.f32 %v1419_v28, %v1405_v44 }
 0x320   : > { %v1425_v24 = vadd.f32 %v1423_v43, %v1398_v12 }
 0x321   : > { %v1566_v61 = vpop.permute.xlu2 %1565 }
 0x324   : > { %v1417_v5 = vpop.permute.xlu1 %1416 }
 0x325   : > { %v1420_v10 = vsel %vm1418_vm3, %v1415_v63, %v1417_v5 }
 0x326   : > { %v1424_v46 = vmul.f32 %v1420_v10, %v1405_v44 }
 0x328   : > { %v1426_v36 = vadd.f32 %v1424_v46, %v1399_v58 }
 0x329   : > { %v1591_v35 = vpop.permute.xlu2 %1590 }
 0x32c   : > { %v1442_v20 = vpop.permute.xlu1 %1441 }
 0x32d   : > { %v1446_v47 = vsel %vm1445_vm6, %v1440_v52, %v1442_v20  ;;  %v1447_v31 = vsel %vm1445_vm6, %v1442_v20, %v1444_v8 }
 0x32e   : > { %v1450_v39 = vmul.f32 %v1446_v47, %v1432_v60  ;;  %v1451_v27 = vmul.f32 %v1447_v31, %v1432_v60  ;;  %v1510_v60 = vpop.permute.xlu0 %1509 }
 0x32f   : > { %v1514_v44 = vsel %vm1513_vm9, %v1508_v23, %v1510_v60 }
 0x330   : > { %v1452_v19 = vadd.f32 %v1450_v39, %v1425_v24  ;;  %v1453_v17 = vadd.f32 %v1451_v27, %v1426_v36  ;;  %v1518_v46 = vmul.f32 %v1514_v44, %v3154_v38 }
 0x331   : > { %v1581_v14 = vpop.permute.xlu2 %1580 }
 0x334   : > { %v1467_v25 = vpop.permute.xlu1 %1466 }
 0x335   : > { %v1473_v40 = vsel %vm1472_vm4, %v1467_v25, %v1469_v55 }
 0x336   : > { %v1477_v57 = vmul.f32 %v1473_v40, %v1459_v34  ;;  %v1539_v2 = vpop.permute.xlu0 %1538 }
 0x337   : > { %v1542_v41 = vsel %vm1540_vm15, %v1537_v6, %v1539_v2 }
 0x338   : > { %v1479_v1 = vadd.f32 %v1477_v57, %v1452_v19 }
 0x339   : > { %v1620_v63 = vpop.permute.xlu2 %1619 }
 0x33a   : > { %v1491_v56 = vsel %vm1483_vm5, %v1479_v1, 0.0 }
 0x33b   : > { %v3158_v7 = vadd.f32 %v1491_v56, %v3135_v22 }
 0x33c   : > { %v1471_v54 = vpop.permute.xlu1 %1470 }
 0x33d   : > { %v1474_v13 = vsel %vm1472_vm4, %v1469_v55, %v1471_v54 }
 0x33e   : > { %v1478_v26 = vmul.f32 %v1474_v13, %v1459_v34  ;;  %v1535_v51 = vpop.permute.xlu0 %1534 }
 0x33f   : > { %v1541_v29 = vsel %vm1540_vm15, %v1535_v51, %v1537_v6 }
 0x340   : > { %v1480_v16 = vadd.f32 %v1478_v26, %v1453_v17 }
 0x341   : > { %v1645_v33 = vpop.permute.xlu2 %1644 }
 0x342   : > { %v1492_v49 = vsel %vm1484_vm7, %v1480_v16, 0.0 }
 0x343   : > { %v3162_v37 = vadd.f32 %v1492_v49, %v3138_v30 }
 0x344   : > { %v1512_v45 = vpop.permute.xlu1 %1511 }
 0x345   : > { %v1515_v30 = vsel %vm1513_vm9, %v1510_v60, %v1512_v45 }
 0x346   : > { %v1554_v18 = vpop.permute.xlu0 %1553  ;;  %v1519_v11 = vmul.f32 %v1515_v30, %v3154_v38 }
 0x349   : > { %v1635_v21 = vpop.permute.xlu2 %1634 }
 0x34c   : > { %v1527_v42 = vpop.permute.xlu1 %1526 }
 0x34d   : > { %v1546_v50 = vmul.f32 %v1542_v41, %v1527_v42  ;;  %v1545_v55 = vmul.f32 %v1541_v29, %v1527_v42 }
 0x34e   : > { %v1589_v48 = vpop.permute.xlu0 %1588 }
 0x34f   : > { %v1548_v24 = vadd.f32 %v1546_v50, %v1519_v11  ;;  %v1547_v47 = vadd.f32 %v1545_v55, %v1518_v46  ;;  %v1595_v40 = vsel %vm1594_vm10, %v1589_v48, %v1591_v35 }
 0x350   : > { %v1599_v1 = vmul.f32 %v1595_v40, %v1581_v14 }
 0x351   : > { %v1674_v17 = vpop.permute.xlu2 %1673 }
 0x354   : > { %v1564_v22 = vpop.permute.xlu1 %1563 }
 0x355   : > { %v1569_v59 = vsel %vm1567_vm8, %v1564_v22, %v1566_v61 }
 0x356   : > { %v1608_v53 = vpop.permute.xlu0 %1607  ;;  %v1573_v12 = vmul.f32 %v1569_v59, %v1554_v18 }
 0x358   : > { %v1575_v36 = vadd.f32 %v1573_v12, %v1548_v24 }
 0x35c   : > { %v1562_v3 = vpop.permute.xlu1 %1561 }
 0x35d   : > { %v1568_v28 = vsel %vm1567_vm8, %v1562_v3, %v1564_v22 }
 0x35e   : > { %v1643_v8 = vpop.permute.xlu0 %1642  ;;  %v1572_v52 = vmul.f32 %v1568_v28, %v1554_v18 }
 0x35f   : > { %v1649_v16 = vsel %vm1648_vm12, %v1643_v8, %v1645_v33 }
 0x360   : > { %v1574_v6 = vadd.f32 %v1572_v52, %v1547_v47  ;;  %v1653_v61 = vmul.f32 %v1649_v16, %v1635_v21 }
 0x362   : > { %v1601_v13 = vadd.f32 %v1599_v1, %v1574_v6 }
 0x364   : > { %v1593_v62 = vpop.permute.xlu1 %1592 }
 0x365   : > { %v1596_v32 = vsel %vm1594_vm10, %v1591_v35, %v1593_v62 }
 0x366   : > { %v1600_v5 = vmul.f32 %v1596_v32, %v1581_v14  ;;  %v1662_v19 = vpop.permute.xlu0 %1661 }
 0x368   : > { %v1602_v31 = vadd.f32 %v1600_v5, %v1575_v36 }
 0x36c   : > { %v1618_v0 = vpop.permute.xlu1 %1617 }
 0x36d   : > { %v1623_v43 = vsel %vm1621_vm11, %v1618_v0, %v1620_v63 }
 0x36e   : > { %v1627_v20 = vmul.f32 %v1623_v43, %v1608_v53 }
 0x370   : > { %v1629_v25 = vadd.f32 %v1627_v20, %v1602_v31 }
 0x374   : > { %v1616_v15 = vpop.permute.xlu1 %1615 }
 0x375   : > { %v1622_v27 = vsel %vm1621_vm11, %v1616_v15, %v1618_v0 }
 0x376   : > { %v1626_v38 = vmul.f32 %v1622_v27, %v1608_v53 }
 0x378   : > { %v1628_v26 = vadd.f32 %v1626_v38, %v1601_v13 }
 0x37a   : > { %v1655_v51 = vadd.f32 %v1653_v61, %v1628_v26 }
 0x37c   : > { %v1647_v58 = vpop.permute.xlu1 %1646 }
 0x37d   : > { %v1650_v10 = vsel %vm1648_vm12, %v1645_v33, %v1647_v58 }
 0x37e   : > { %v1654_v39 = vmul.f32 %v1650_v10, %v1635_v21 }
 0x380   : > { %v1656_v56 = vadd.f32 %v1654_v39, %v1629_v25  ;;  %v3276_v25 = vld [vmem:[#allocation12_spill] sm:$0xff] }
 0x384   : > { %v1672_v34 = vpop.permute.xlu1 %1671 }
 0x385   : > { %v1677_v57 = vsel %vm1675_vm13, %v1672_v34, %v1674_v17 }
 0x386   : > { %v1681_v54 = vmul.f32 %v1677_v57, %v1662_v19 }
 0x388   : > { %v1683_v23 = vadd.f32 %v1681_v54, %v1656_v56 }
 0x38a   : > { %v1695_v60 = vsel %vm1687_vm14, %v1683_v23, 0.0 }
 0x38b   : > { %v1697_v45 = vadd.f32 %v1695_v60, %v3162_v37 }
 0x38c   : > { %v1670_v49 = vpop.permute.xlu1 %1669 }
 0x38d   : > { %v1706_v2 = vsel %vm1698_vm1, %v1697_v45, 0.0  ;;  %v1676_v42 = vsel %vm1675_vm13, %v1670_v49, %v1672_v34 }
 0x38e   : > { %v1707_v35 = vrot.slane %v1706_v2, 4  ;;  %v1680_v22 = vmul.f32 %v1676_v42, %v1662_v19 }
 0x390   : > { %v1708_v9 = vadd.f32 %v1707_v35, %v1706_v2  ;;  %v1682_v14 = vadd.f32 %v1680_v22, %v1655_v51 }
 0x392   : > { %v1709_v3 = vrot.slane %v1708_v9, 2  ;;  %v1694_v18 = vsel %vm1686_vm2, %v1682_v14, 0.0 }
 0x393   : > { %v1696_v62 = vadd.f32 %v1694_v18, %v3158_v7 }
 0x394   : > { %v1710_v63 = vadd.f32 %v1709_v3, %v1708_v9 }
 0x395   : > { %v1699_v37 = vsel %vm1698_vm1, %v1696_v62, 0.0 }
 0x396   : > { %v1711_v48 = vrot.slane %v1710_v63, 1  ;;  %v1700_v0 = vrot.slane %v1699_v37, 4 }
 0x398   : > { %v1712_v33 = vadd.f32 %v1711_v48, %v1710_v63  ;;  %v1701_v53 = vadd.f32 %v1700_v0, %v1699_v37 }
 0x39a   : > { %v1869_v15 = vmul.f32 -1.442695, %v1712_v33  ;;  %v1702_v41 = vrot.slane %v1701_v53, 2 }
 0x39c   : > { %2082 = vpow2.f32 %v1869_v15  ;;  %v1703_v30 = vadd.f32 %v1702_v41, %v1701_v53 }
 0x39e   : > { %v1704_v59 = vrot.slane %v1703_v30, 1 }
 0x3a0   : > { %v1705_v21 = vadd.f32 %v1704_v59, %v1703_v30 }
 0x3a2   : > { %v2083_v4 = vpop.eup %2082  ;;  %v1868_v50 = vmul.f32 -1.442695, %v1705_v21 }
 0x3a3   : > { %v1720_v8 = vadd.f32 1.0, %v2083_v4 }
 0x3a4   : > { %2084 = vpow2.f32 %v1868_v50 }
 0x3a5   : > { %2086 = vrcp.f32 %v1720_v8  ;;  %v1747_v43 = vand.u32 2147483648, %v1720_v8  ;;  %vm1741_vm6 = vweird.f32 %v1720_v8  ;;  %v1745_v24 = vand.u32 2147483647, %v1720_v8 }
 0x3a7   : > { %v1748_v36 = vor.u32 1.1754944e-38, %v1747_v43  ;;  %vm1746_vm7 = vcmp.eq.f32.partialorder %v1745_v24, 8.507059e+37 }
 0x3aa   : > { %v2085_v32 = vpop.eup %2084 }
 0x3ab   : > { %v2087_v7 = vpop.eup %2086  ;;  %v1719_v11 = vadd.f32 1.0, %v2085_v32 }
 0x3ac   : > { %v1737_v12 = vmul.f32 %v2087_v7, %v1720_v8  ;;  %vm1742_vm3 = vweird.f32 %v2087_v7 }
 0x3ad   : > { %2088 = vrcp.f32 %v1719_v11  ;;  %vm1743_vm4 = vmor %vm1741_vm6, %vm1742_vm3  ;;  %v1732_v46 = vand.u32 2147483648, %v1719_v11  ;;  %v1730_v20 = vand.u32 2147483647, %v1719_v11  ;;  %vm1726_vm15 = vweird.f32 %v1719_v11 }
 0x3ae   : > { %v1738_v58 = vsub.f32 1.0, %v1737_v12 }
 0x3af   : > { %v1733_v39 = vor.u32 1.1754944e-38, %v1732_v46  ;;  %vm1731_vm9 = vcmp.eq.f32.partialorder %v1730_v20, 8.507059e+37 }
 0x3b0   : > { %v1739_v29 = vmul.f32 %v2087_v7, %v1738_v58 }
 0x3b2   : > { %v1740_v44 = vadd.f32 %v2087_v7, %v1739_v29 }
 0x3b3   : > { %v2089_v28 = vpop.eup %2088 }
 0x3b4   : > { %v1722_v55 = vmul.f32 %v2089_v28, %v1719_v11  ;;  %v1744_v10 = vsel %vm1743_vm4, %v2087_v7, %v1740_v44  ;;  %vm1727_vm5 = vweird.f32 %v2089_v28 }
 0x3b5   : > { %v1749_v47 = vsel %vm1746_vm7, %v1748_v36, %v1744_v10  ;;  %vm1728_vm8 = vmor %vm1726_vm15, %vm1727_vm5 }
 0x3b6   : > { %v1723_v5 = vsub.f32 1.0, %v1722_v55  ;;  %v1753_v19 = vrot.slane %v1749_v47, 4 }
 0x3b8   : > { %v1724_v52 = vmul.f32 %v2089_v28, %v1723_v5 }
 0x3ba   : > { %v1725_v31 = vadd.f32 %v2089_v28, %v1724_v52 }
 0x3bc   : > { %v1729_v27 = vsel %vm1728_vm8, %v2089_v28, %v1725_v31 }
 0x3bd   : > { %v1734_v17 = vsel %vm1731_vm9, %v1733_v39, %v1729_v27 }
 0x3be   : > { %v1754_v6 = vsel %vm184_vm0, %v1734_v17, %v1753_v19 }
 0x3bf   : > { %v1756_v34 = vmul.f32 %v1754_v6, %v3276_v25 }
 0x3c1   : > { %1757 = vst [vmem:[%s176_s13] sm:$0xff] %v1756_v34 }
 0x3c2   : > { %2177 = shalt.err (!%p2174_p11)
}
 0x3c3   : > { %1883 = dma.vmem_to_hbm [thread:$0]  (%p2403_p3), %s1773_s6, 128, %s1775_s7, %s1759_s8  }
 0x3c4 PF: > { %s1786_s28 = sand.u32 1, %s2208_s9   ;;  %p3277_p12 = scmp.ge.s32.totalorder %s2220_s12, 2 }
 0x3c5   : > { %s1787_s24 = scalar_lea.sflag [#allocation5], %s1786_s28 }
 0x3c6   : > { %p1894_p13 = pnand %p3277_p12, %p2372_p6 }
 0x3c8   : > { %p1895_p0 = pneg %p1894_p13 }
 0x3ca   : > { %2203 = dma.done.wait (%p1895_p0), %s1787_s24, 128  }
 0x3cb   : > { %2205 = vsyncadd (%p1895_p0), %s1787_s24, 4294967168  ;;  %p16_p5 = scmp.ge.s32.totalorder %s2390_s23, 4   ;;  %s3278_s9 = smov %s2212_s10 }
 0x3cc   : > { %s3279_s10 = smov %s2216_s11  ;;  %s3280_s11 = smov %s2399_s26 }
 0x3cd   : > { %s3281_s12 = smov %s2390_s23  ;;  %18 = sbr.rel (!%p16_p5) target bundleno = 6 (0x6), region = 79 }
 0x3d2   :  { %1793 = vsyncpa [#allocation4], 1 }
 0x3d3   :  { %1795 = vsyncpa [#allocation4 + $0x1], 1 }
 0x3d4   :  { %1796 = vsyncpa [#allocation7], 1 }
 0x3d5   :  { %1798 = vsyncpa [#allocation7 + $0x1], 1 }
 0x3d6   :  { %1799 = vsyncpa [#allocation5], 1 }
 0x3d7   :  { %1801 = vsyncpa [#allocation5 + $0x1], 1 }

</bundles_post_ra>
